<compile_context>
chip_gen: v7x
topology: tpu7x:2x2x1
jax: 0.10.0
libtpu: 0.0.40
codegen_flags: <defaults>
</compile_context>

<pallas_src>
import jax
import jax.numpy as jnp
from jax.experimental import pallas as pl
from jax.experimental.pallas import tpu as pltpu


# ---------------------------------------------------------------------------
# Kernels
# ---------------------------------------------------------------------------

def _log_softmax_kernel(x_ref, o_ref):
    """Full-row tile: whole reduction axis (lanes) lives inside one block."""
    x = x_ref[...]
    # Row max is exact in any dtype (bf16 stays bf16 on v6e/v7x VPU).
    row_max = jnp.max(x, axis=-1, keepdims=True)
    # exp / sum accumulate in f32.
    sum_exp = jnp.sum(
        jnp.exp((x - row_max).astype(jnp.float32)), axis=-1, keepdims=True)
    # Fused epilogue: lse per row, then o = x - lse (only x + transient live).
    lse = row_max.astype(jnp.float32) + jnp.log(sum_exp)
    o_ref[...] = (x.astype(jnp.float32) - lse).astype(o_ref.dtype)


# ---------------------------------------------------------------------------
# Tiling heuristics
# ---------------------------------------------------------------------------

_TINY_BYTES = 512 * 1024       # below this: single block (overhead dominated)
_MAX_BLOCK_ROWS = 512          # 512-row tiles already hit ~85% of HBM roofline


def _sublane(itemsize: int) -> int:
    return 8 if itemsize >= 4 else (16 if itemsize == 2 else 32)


def _vmem_budgets():
    """(scoped vmem limit, tile budget) chosen per TPU generation."""
    try:
        info = pltpu.get_tpu_info()
        vmem = getattr(info, "vmem_capacity_bytes", None)
        if vmem is not None and vmem >= 100 * 1024 * 1024:
            # v5e / v6e: 128 MiB physical VMEM per TensorCore.
            return 48 * 1024 * 1024, 40 * 1024 * 1024
    except Exception:
        pass
    # v7x (64 MiB physical VMEM) or unknown generation: stay conservative.
    return 32 * 1024 * 1024, 22 * 1024 * 1024


def _choose_block_rows(B: int, D: int, itemsize: int, tile_budget: int) -> int:
    """Row-tile size for the full-row kernel. Returns 0 => use split-D path."""
    sub = _sublane(itemsize)
    # Per-row VMEM cost: double-buffered in+out tiles + ~1 f32 transient row.
    per_row = D * (4 * itemsize + 4)
    fit_rows = (tile_budget // per_row) // sub * sub
    if fit_rows < sub:
        return 0  # even the minimum row tile does not fit -> split D

    total_bytes = B * D * itemsize
    if total_bytes <= _TINY_BYTES and B <= fit_rows:
        # Truly tiny: one block covering the whole array (launch-overhead bound).
        return B

    block_rows = min(fit_rows, _MAX_BLOCK_ROWS)

    # Force a multi-step grid so pipelining engages and (on v7x) the parallel
    # axis shards across both TensorCores.
    if B >= 4 * sub:
        min_steps = 4
    elif B >= 2 * sub:
        min_steps = 2
    else:
        min_steps = 1
    if min_steps > 1:
        cap = max(sub, ((-(-B // min_steps)) // sub) * sub)  # ceil, floor-align
        block_rows = min(block_rows, cap)

    # Never pick a block taller than the (sublane-rounded) batch.
    block_rows = min(block_rows, (-(-B // sub)) * sub)
    return max(sub, block_rows)


# ---------------------------------------------------------------------------
# Wide-D fallback: two-pass split-D (online logsumexp, then x - lse)
# ---------------------------------------------------------------------------

def _wide_d_log_softmax(x, tile_budget: int, vmem_limit: int):
    B, D = x.shape
    itemsize = jnp.dtype(x.dtype).itemsize
    sub = _sublane(itemsize)
    block_rows = sub
    per_elem = 4 * itemsize + 4
    max_chunk = max(128, tile_budget // (block_rows * per_elem))
    d_chunk = min((max_chunk // 128) * 128, D)
    n_row = pl.cdiv(B, block_rows)
    n_d = pl.cdiv(D, d_chunk)

    # ---- pass 1: per-row logsumexp (running max/sum over D chunks) ----
    def lse_kernel(x_ref, lse_ref, m_sc, s_sc):
        j = pl.program_id(1)

        @pl.when(j == 0)
        def _():
            m_sc[...] = jnp.full_like(m_sc, -jnp.inf)
            s_sc[...] = jnp.zeros_like(s_sc)

        xf = x_ref[...].astype(jnp.float32)
        # Mask out-of-range lanes in the (possibly partial) last D chunk.
        col = j * d_chunk + jax.lax.broadcasted_iota(jnp.int32, xf.shape, 1)
        xf = jnp.where(col < D, xf, -jnp.inf)

        m_prev = m_sc[...]
        m_new = jnp.maximum(m_prev, jnp.max(xf, axis=-1, keepdims=True))
        s_sc[...] = (s_sc[...] * jnp.exp(m_prev - m_new)
                     + jnp.sum(jnp.exp(xf - m_new), axis=-1, keepdims=True))
        m_sc[...] = m_new

        @pl.when(j == pl.num_programs(1) - 1)
        def _():
            lse_ref[...] = m_sc[...] + jnp.log(s_sc[...])

    lse = pl.pallas_call(
        lse_kernel,
        out_shape=jax.ShapeDtypeStruct((B, 1), jnp.float32),
        grid_spec=pltpu.PrefetchScalarGridSpec(
            num_scalar_prefetch=0,
            grid=(n_row, n_d),
            in_specs=[pl.BlockSpec((block_rows, d_chunk), lambda i, j: (i, j))],
            out_specs=pl.BlockSpec((block_rows, 1), lambda i, j: (i, 0)),
            scratch_shapes=[pltpu.VMEM((block_rows, 1), jnp.float32),
                            pltpu.VMEM((block_rows, 1), jnp.float32)],
        ),
        compiler_params=pltpu.CompilerParams(
            dimension_semantics=("parallel", "arbitrary"),
            vmem_limit_bytes=vmem_limit,
        ),
    )(x)

    # ---- pass 2: o = x - lse (pure streaming) ----
    def sub_kernel(x_ref, lse_ref, o_ref):
        o_ref[...] = (x_ref[...].astype(jnp.float32)
                      - lse_ref[...]).astype(o_ref.dtype)

    return pl.pallas_call(
        sub_kernel,
        out_shape=jax.ShapeDtypeStruct((B, D), x.dtype),
        grid_spec=pltpu.PrefetchScalarGridSpec(
            num_scalar_prefetch=0,
            grid=(n_row, n_d),
            in_specs=[pl.BlockSpec((block_rows, d_chunk), lambda i, j: (i, j)),
                      pl.BlockSpec((block_rows, 1), lambda i, j: (i, 0))],
            out_specs=pl.BlockSpec((block_rows, d_chunk), lambda i, j: (i, j)),
        ),
        compiler_params=pltpu.CompilerParams(
            dimension_semantics=("parallel", "parallel"),
            vmem_limit_bytes=vmem_limit,
        ),
    )(x, lse)


# ---------------------------------------------------------------------------
# Public wrapper (matches ModelNew.forward semantics: log_softmax over dim=1)
# ---------------------------------------------------------------------------

def log_softmax(x: jnp.ndarray, *, _tile_budget_bytes=None,
                _vmem_limit_bytes=None) -> jnp.ndarray:
    """LogSoftmax along axis 1 of a 2D array (batch, dim)."""
    assert x.ndim == 2, "expected (batch, dim) input"
    B, D = x.shape
    itemsize = jnp.dtype(x.dtype).itemsize

    vmem_limit, tile_budget = _vmem_budgets()
    if _vmem_limit_bytes is not None:
        vmem_limit = _vmem_limit_bytes
    if _tile_budget_bytes is not None:
        tile_budget = _tile_budget_bytes

    block_rows = _choose_block_rows(B, D, itemsize, tile_budget)
    if block_rows == 0:
        # Reduction axis too wide for a full-row tile: split-D two-pass path.
        return _wide_d_log_softmax(x, tile_budget, vmem_limit)

    grid = (pl.cdiv(B, block_rows),)
    cost = pl.CostEstimate(
        flops=5 * B * D,
        transcendentals=B * D,
        bytes_accessed=2 * B * D * itemsize,
    )

    return pl.pallas_call(
        _log_softmax_kernel,
        out_shape=jax.ShapeDtypeStruct((B, D), x.dtype),
        grid_spec=pltpu.PrefetchScalarGridSpec(
            num_scalar_prefetch=0,
            grid=grid,
            in_specs=[pl.BlockSpec((block_rows, D), lambda i: (i, 0))],
            out_specs=pl.BlockSpec((block_rows, D), lambda i: (i, 0)),
        ),
        compiler_params=pltpu.CompilerParams(
            dimension_semantics=("parallel",),
            vmem_limit_bytes=vmem_limit,
        ),
        cost_estimate=cost,
    )(x)


if __name__ == "__main__":
    key = jax.random.PRNGKey(0)

    # Module's native shape: (batch_size, dim) = (16, 16384), softmax over dim=1.
    B, D = 16, 16384
    x = jax.random.normal(key, (B, D), dtype=jnp.float32)
    out = jax.block_until_ready(log_softmax(x))
    ref = jax.nn.log_softmax(x, axis=1)
    assert out.shape == (B, D)
    assert jnp.allclose(out, ref, atol=1e-4, rtol=1e-5)

    # Batch not a multiple of the sublane width (padded last block path).
    x2 = jax.random.normal(jax.random.PRNGKey(1), (13, 384), dtype=jnp.float32)
    out2 = jax.block_until_ready(log_softmax(x2))
    assert jnp.allclose(out2, jax.nn.log_softmax(x2, axis=1),
                        atol=1e-4, rtol=1e-5)

    # Force the split-D (online logsumexp) fallback with a tiny tile budget:
    # exercises chunked reduction, scratch carry, and masked partial chunk.
    x3 = jax.random.normal(jax.random.PRNGKey(2), (13, 300), dtype=jnp.float32)
    out3 = jax.block_until_ready(log_softmax(x3, _tile_budget_bytes=32 * 1024))
    assert jnp.allclose(out3, jax.nn.log_softmax(x3, axis=1),
                        atol=1e-4, rtol=1e-5)

    print("KERNEL_OK")
</pallas_src>

<mosaic_0001>
module attributes {stable_mosaic.version = 11 : i64} {
  func.func @_log_softmax_kernel(%arg0: i32, %arg1: memref<8x16384xf32, #tpu.memory_space<vmem>>, %arg2: memref<8x16384xf32, #tpu.memory_space<vmem>>) attributes {dimension_semantics = [#tpu.dimension_semantics<parallel>], iteration_bounds = array<i64: 2>, scalar_prefetch = 0 : i64, scratch_operands = 0 : i64, tpu.core_type = #tpu.core_type<tc>, window_params = [{transform_indices = @transform_0, window_bounds = array<i64: 8, 16384>}, {transform_indices = @transform_1, window_bounds = array<i64: 8, 16384>}]} {
    %c0 = arith.constant 0 : index
    %c0_0 = arith.constant 0 : index
    %0 = vector.load %arg1[%c0, %c0_0] : memref<8x16384xf32, #tpu.memory_space<vmem>>, vector<8x16384xf32>
    %cst = arith.constant dense<0xFF800000> : vector<8xf32>
    %1 = vector.multi_reduction <maximumf>, %0, %cst [1] : vector<8x16384xf32> to vector<8xf32>
    %2 = vector.shape_cast %1 : vector<8xf32> to vector<8x1xf32>
    %3 = vector.broadcast %2 : vector<8x1xf32> to vector<8x16384xf32>
    %4 = arith.subf %0, %3 : vector<8x16384xf32>
    %5 = math.exp %4 : vector<8x16384xf32>
    %cst_1 = arith.constant dense<0.000000e+00> : vector<8xf32>
    %6 = vector.multi_reduction <add>, %5, %cst_1 [1] : vector<8x16384xf32> to vector<8xf32>
    %7 = vector.shape_cast %6 : vector<8xf32> to vector<8x1xf32>
    %8 = math.log %7 : vector<8x1xf32>
    %9 = arith.addf %2, %8 : vector<8x1xf32>
    %10 = vector.broadcast %9 : vector<8x1xf32> to vector<8x16384xf32>
    %11 = arith.subf %0, %10 : vector<8x16384xf32>
    %c0_2 = arith.constant 0 : index
    %c0_3 = arith.constant 0 : index
    %12 = vector.load %arg2[%c0_2, %c0_3] : memref<8x16384xf32, #tpu.memory_space<vmem>>, vector<8x16384xf32>
    tpu.vector_store %arg2[%c0_2, %c0_3], %11 {strides = array<i32>} : memref<8x16384xf32, #tpu.memory_space<vmem>>, vector<8x16384xf32>,
    return
  }
  func.func @transform_0(%arg0: i32) -> (i32, i32) {
    %c0_i32 = arith.constant 0 : i32
    %c0_i32_0 = arith.constant 0 : i32
    return %arg0, %c0_i32 : i32, i32
  }
  func.func @transform_1(%arg0: i32) -> (i32, i32) {
    %c0_i32 = arith.constant 0 : i32
    %c0_i32_0 = arith.constant 0 : i32
    return %arg0, %c0_i32 : i32, i32
  }
}

</mosaic_0001>

<bundles_post_ra>
// kernel: tpu_custom_call.1
= control target key start
LH: loop header
LB: loop body
LE: loop exit
PB: predicated region body
PF: predicated region fallthrough
CT: control target
= control target key end

     0   :  { %6 = vsyncpa [#allocation3], 0  ;;  %s3100_s0 = inlined_call_operand.hbm [shape: f32[16,16384], index: 0, kind: input, shape index: {}]   ;;  %s3101_s1 = inlined_call_operand.hbm [shape: f32[16,16384], index: 1, kind: output, shape index: {}]  }
   0x1   :  { %8 = vsyncpa [#allocation3 + $0x1], 0 }
   0x2   :  { %9 = vsyncpa [#allocation4], 0 }
   0x3   :  { %11 = vsyncpa [#allocation4 + $0x1], 0  ;;  %s1805_s6 = smov 0   ;;  %s1807_s7 = smov 0  }
   0x4   :  { %s1809_s8 = smov 0   ;;  %s1811_s9 = smov 0  }
   0x5 LB: > { %s1826_s10 = sadd.s32 4294967295, %s1791_s9   ;;  %s1247_s11 = sadd.s32 4294967294, %s1791_s9   ;;  %s1791_s9 = sphi %s1811_s9, %s3233_s9   ;;  %s1787_s8 = sphi %s1809_s8, %s3232_s8   ;;  %s1783_s7 = sphi %s1807_s7, %s3231_s7   ;;  %s1779_s6 = sphi %s1805_s6, %s3230_s6  }
   0x6   : > { %s1830_s12 = sadd.s32 1, %s1791_s9   ;;  %s24_s13 = sadd.s32 1, %s1787_s8 }
   0x7   : > { %s21_s14 = ssub.s32 %s1791_s9, %s1830_s12  ;;  %p31_p0 = scmp.ne.s32.totalorder %s1787_s8, %s1783_s7 }
   0x8   : > { %p22_p1 = scmp.eq.s32.totalorder %s21_s14, 0  ;;  %p32_p2 = scmp.eq.s32.totalorder %s1791_s9, 0 }
   0x9   : > { %p37_p3 = scmp.ne.s32.totalorder %s1783_s7, %s1779_s6  ;;  %p38_p4 = scmp.eq.s32.totalorder %s1826_s10, 0 }
   0xa   : > { %s1842_s15 = scalar_select %p22_p1, %s1787_s8, %s24_s13  }
   0xb   : > { %p1844_p5 = por %p32_p2, %p31_p0  ;;  %p1848_p6 = por %p38_p4, %p37_p3 }
   0xc   : > { %p61_p7 = scmp.eq.s32.totalorder %s1826_s10, 1  ;;  %p67_p8 = scmp.eq.s32.totalorder %s1247_s11, 1 }
   0xd   : > { %p1275_p10 = scmp.lt.s32.totalorder %s1791_s9, 2  ;;  %s87_s20 = sand.u32 1, %s1787_s8  }
   0xe   : > { %p1855_p11 = por %p61_p7, %p31_p0  ;;  %p1859_p12 = por %p67_p8, %p37_p3 }
   0xf   : > { %s1261_s21 = sshll.u32 %s1791_s9, 14  ;;  %s1250_s22 = sshll.u32 %s87_s20, 10 }
  0x10   : > { %s3144_s18 = scalar_select %p1855_p11, 1, 0 }
  0x11   : > { %s3145_s19 = scalar_select %p1859_p12, 1, 0 }
  0x12   : > { %s1868_s25 = scalar_lea.hbm %s3100_s0, %s1261_s21  ;;  %s91_s26 = scalar_lea.vmem [#allocation2], %s1250_s22 }
  0x13   : > { %s99_s27 = sshll.u32 %s91_s26, 4  ;;  %p1872_p13 = pnand %p1275_p10, %p1844_p5  ;;  %s1876_s27 = int_to_ptr.vmem [resolvable:$true] %s99_s27 }
  0x14   : > { %s88_s29 = scalar_lea.sflag [#allocation3], %s87_s20  ;;  %s1695_s30 = scalar_lea.hbm %s1868_s25, 16384 }
  0x15   : > { %p1696_p2 = scmp.ne.s32.totalorder %s1868_s25, %s1695_s30  ;;  %p1697_p3 = pneg %p1872_p13 }
  0x16   : > { %s1700_s4 = scalar_lea.hbm %s3100_s0, 32768  ;;  %p1701_p5 = scmp.lt.u32.totalorder %s1868_s25, %s3100_s0 }
  0x17   : > { %p1698_p4 = pnand %p1697_p3, %p1696_p2  ;;  %p1702_p8 = scmp.lt.u32.totalorder %s1700_s4, %s1695_s30 }
  0x18   : > { %p1704_p9 = scmp.lt.u32.totalorder %s1695_s30, %s1868_s25 }
  0x19   : > { %p1699_p7 = pneg %p1698_p4  ;;  %p1703_p10 = por %p1702_p8, %p1701_p5 }
  0x1b   : > { %p1705_p0 = por %p1704_p9, %p1703_p10 }
  0x1d   : > { %p1706_p1 = pnand %p1705_p0, %p1699_p7 }
  0x1f   : > { %1709 = shalt.err (!%p1706_p1)
}
  0x20   : > { %s1710_s13 = scalar_lea.vmem %s1876_s27, 16384  ;;  %s1793_s14 = smov [#allocation2]  }
  0x21   : > { %p1711_p2 = scmp.ne.s32.totalorder %s1876_s27, %s1710_s13  ;;  %s1715_s16 = sshll.u32 %s1793_s14, 4  ;;  %s1716_s16 = int_to_ptr.vmem [resolvable:$false] %s1715_s16 }
  0x22   : > { %s1717_s20 = scalar_lea.vmem %s1716_s16, 32768  ;;  %p1718_p11 = scmp.lt.s32.totalorder %s1876_s27, %s1716_s16 }
  0x23   : > { %p1713_p4 = pnand %p1711_p2, %p1697_p3  ;;  %p1719_p5 = scmp.lt.s32.totalorder %s1717_s20, %s1710_s13 }
  0x25   : > { %p1714_p12 = pneg %p1713_p4  ;;  %p1720_p8 = por %p1719_p5, %p1718_p11 }
  0x27   : > { %p1721_p9 = pnand %p1720_p8, %p1714_p12 }
  0x29   : > { %1724 = shalt.err (!%p1721_p9)
}
  0x2a   : > { %1270 = dma.hbm_to_vmem [thread:$0]  (!%p1872_p13), %s1868_s25, 16384, %s1876_s27, %s88_s29  }
  0x2b   : > { %p3147_p0 = scmp.lt.s32.totalorder %s1791_s9, 3  ;;  %p3148_p1 = scmp.ge.s32.totalorder %s1791_s9, 1 }
  0x2d   : > { %p105_p3 = pnand %p3148_p1, %p3147_p0 }
  0x2f   : > { %108 = sbr.rel (%p105_p3) target bundleno = 954 (0x3ba), region = 24 }
  0x36   : > { %s1910_s21 = sand.u32 1, %s1783_s7  }
  0x37   : > { %s1254_s22 = sshll.u32 %s1910_s21, 10  ;;  %s111_s23 = scalar_lea.sflag [#allocation3], %s1910_s21 }
  0x38   : > { %s1916_s24 = scalar_lea.vmem [#allocation2], %s1254_s22 }
  0x39   : > { %1770 = dma.done.wait (%p1848_p6), %s111_s23, 16384  }
  0x3a   : > { %1772 = vsyncadd (%p1848_p6), %s111_s23, 4294950912  ;;  %v1923_v0 = vld [vmem:[%s1916_s24 + $0x40] sm:$0xff]  ;;  %v1926_v1 = vld [vmem:[%s1916_s24 + $0x48] sm:$0xff]  ;;  %s2689_s17 = scalar_lea.vmem [#allocation5], %s1254_s22  ;;  %s1262_s25 = sshll.u32 %s1826_s10, 14 }
  0x3b   : > { %v1929_v2 = vld [vmem:[%s1916_s24 + $0x50] sm:$0xff]  ;;  %v265_v3 = vmax.f32 %v1926_v1, %v1923_v0  ;;  %v1934_v4 = vld [vmem:[%s1916_s24 + $0x58] sm:$0xff]  ;;  %v1938_v6 = vld [vmem:[%s1916_s24 + $0x60] sm:$0xff]  ;;  %s1177_s26 = sshll.u32 %s2689_s17, 4  ;;  %s3048_s28 = scalar_lea.hbm %s3101_s1, %s1262_s25  ;;  %s3050_s26 = int_to_ptr.vmem [resolvable:$true] %s1177_s26 }
  0x3c   : > { %v1942_v8 = vld [vmem:[%s1916_s24 + $0x68] sm:$0xff]  ;;  %v1946_v10 = vld [vmem:[%s1916_s24 + $0x70] sm:$0xff]  ;;  %v1950_v12 = vld [vmem:[%s1916_s24 + $0x78] sm:$0xff]  ;;  %s1163_s29 = scalar_lea.sflag [#allocation4], %s1910_s21  ;;  %s1725_s30 = scalar_lea.vmem %s3050_s26, 16384 }
  0x3d   : > { %v266_v5 = vmax.f32 %v1929_v2, %v265_v3  ;;  %v1954_v14 = vld [vmem:[%s1916_s24 + $0x80] sm:$0xff]  ;;  %v1958_v16 = vld [vmem:[%s1916_s24 + $0x88] sm:$0xff]  ;;  %v1962_v18 = vld [vmem:[%s1916_s24 + $0x90] sm:$0xff]  ;;  %p1726_p6 = scmp.ne.s32.totalorder %s3050_s26, %s1725_s30  ;;  %p3227_p11 = scmp.ne.s32.totalorder %s3144_s18, 0 }
  0x3e   : > { %v1966_v20 = vld [vmem:[%s1916_s24 + $0x98] sm:$0xff]  ;;  %v1970_v22 = vld [vmem:[%s1916_s24 + $0xa0] sm:$0xff]  ;;  %v1974_v24 = vld [vmem:[%s1916_s24 + $0xa8] sm:$0xff]  ;;  %s1794_s2 = smov [#allocation5]  }
  0x3f   : > { %v267_v7 = vmax.f32 %v1934_v4, %v266_v5  ;;  %v1978_v26 = vld [vmem:[%s1916_s24 + $0xb0] sm:$0xff]  ;;  %v1982_v28 = vld [vmem:[%s1916_s24 + $0xb8] sm:$0xff]  ;;  %v1986_v30 = vld [vmem:[%s1916_s24 + $0xc0] sm:$0xff]  ;;  %p1727_p12 = pnand %p1726_p6, %p3227_p11  ;;  %s1729_s3 = sshll.u32 %s1794_s2, 4  ;;  %s1730_s3 = int_to_ptr.vmem [resolvable:$false] %s1729_s3 }
  0x40   : > { %v1990_v32 = vld [vmem:[%s1916_s24 + $0xc8] sm:$0xff]  ;;  %v1994_v34 = vld [vmem:[%s1916_s24 + $0xd0] sm:$0xff]  ;;  %v1998_v36 = vld [vmem:[%s1916_s24 + $0xd8] sm:$0xff]  ;;  %s1731_s4 = scalar_lea.vmem %s1730_s3, 32768  ;;  %p1732_p7 = scmp.lt.s32.totalorder %s3050_s26, %s1730_s3 }
  0x41   : > { %v268_v9 = vmax.f32 %v1938_v6, %v267_v7  ;;  %v2002_v38 = vld [vmem:[%s1916_s24 + $0xe0] sm:$0xff]  ;;  %v2006_v40 = vld [vmem:[%s1916_s24 + $0xe8] sm:$0xff]  ;;  %v2010_v42 = vld [vmem:[%s1916_s24 + $0xf0] sm:$0xff]  ;;  %p1728_p13 = pneg %p1727_p12  ;;  %p1733_p10 = scmp.lt.s32.totalorder %s1731_s4, %s1725_s30 }
  0x42   : > { %v2014_v44 = vld [vmem:[%s1916_s24 + $0xf8] sm:$0xff]  ;;  %v2018_v46 = vld [vmem:[%s1916_s24 + $0x100] sm:$0xff]  ;;  %v2022_v48 = vld [vmem:[%s1916_s24 + $0x108] sm:$0xff] }
  0x43   : > { %v269_v11 = vmax.f32 %v1942_v8, %v268_v9  ;;  %v2026_v50 = vld [vmem:[%s1916_s24 + $0x110] sm:$0xff]  ;;  %v2030_v52 = vld [vmem:[%s1916_s24 + $0x118] sm:$0xff]  ;;  %v2034_v54 = vld [vmem:[%s1916_s24 + $0x120] sm:$0xff]  ;;  %p1734_p2 = por %p1733_p10, %p1732_p7 }
  0x44   : > { %v2038_v56 = vld [vmem:[%s1916_s24 + $0x128] sm:$0xff]  ;;  %v2042_v58 = vld [vmem:[%s1916_s24 + $0x130] sm:$0xff]  ;;  %v2046_v60 = vld [vmem:[%s1916_s24 + $0x138] sm:$0xff] }
  0x45   : > { %v270_v13 = vmax.f32 %v1946_v10, %v269_v11  ;;  %v2050_v62 = vld [vmem:[%s1916_s24 + $0x140] sm:$0xff]  ;;  %v2054_v3 = vld [vmem:[%s1916_s24 + $0x148] sm:$0xff]  ;;  %v2058_v7 = vld [vmem:[%s1916_s24 + $0x150] sm:$0xff]  ;;  %p1735_p4 = pnand %p1734_p2, %p1728_p13 }
  0x46   : > { %v2062_v11 = vld [vmem:[%s1916_s24 + $0x158] sm:$0xff] }
  0x47   : > { %v271_v15 = vmax.f32 %v1950_v12, %v270_v13 }
  0x49   : > { %v272_v17 = vmax.f32 %v1954_v14, %v271_v15  ;;  %v2066_v15 = vld [vmem:[%s1916_s24 + $0x160] sm:$0xff] }
  0x4b   : > { %v273_v19 = vmax.f32 %v1958_v16, %v272_v17 }
  0x4d   : > { %v274_v21 = vmax.f32 %v1962_v18, %v273_v19  ;;  %v2070_v19 = vld [vmem:[%s1916_s24 + $0x168] sm:$0xff] }
  0x4f   : > { %v275_v23 = vmax.f32 %v1966_v20, %v274_v21 }
  0x51   : > { %v276_v25 = vmax.f32 %v1970_v22, %v275_v23  ;;  %v2074_v23 = vld [vmem:[%s1916_s24 + $0x170] sm:$0xff] }
  0x53   : > { %v277_v27 = vmax.f32 %v1974_v24, %v276_v25 }
  0x55   : > { %v278_v29 = vmax.f32 %v1978_v26, %v277_v27  ;;  %v2078_v27 = vld [vmem:[%s1916_s24 + $0x178] sm:$0xff] }
  0x57   : > { %v279_v31 = vmax.f32 %v1982_v28, %v278_v29 }
  0x59   : > { %v280_v33 = vmax.f32 %v1986_v30, %v279_v31  ;;  %v2082_v31 = vld [vmem:[%s1916_s24 + $0x180] sm:$0xff] }
  0x5a   : > { %3149 = vst [vmem:[#allocation8_spill] sm:$0xff] %v2082_v31 }
  0x5b   : > { %v281_v35 = vmax.f32 %v1990_v32, %v280_v33 }
  0x5d   : > { %v282_v37 = vmax.f32 %v1994_v34, %v281_v35  ;;  %v2086_v35 = vld [vmem:[%s1916_s24 + $0x188] sm:$0xff] }
  0x5e   : > { %3150 = vst [vmem:[#allocation9_spill] sm:$0xff] %v2086_v35 }
  0x5f   : > { %v283_v39 = vmax.f32 %v1998_v36, %v282_v37 }
  0x61   : > { %v284_v41 = vmax.f32 %v2002_v38, %v283_v39  ;;  %v2090_v39 = vld [vmem:[%s1916_s24 + $0x190] sm:$0xff] }
  0x62   : > { %3151 = vst [vmem:[#allocation10_spill] sm:$0xff] %v2090_v39 }
  0x63   : > { %v285_v43 = vmax.f32 %v2006_v40, %v284_v41 }
  0x65   : > { %v286_v45 = vmax.f32 %v2010_v42, %v285_v43  ;;  %v2094_v43 = vld [vmem:[%s1916_s24 + $0x198] sm:$0xff] }
  0x66   : > { %3152 = vst [vmem:[#allocation11_spill] sm:$0xff] %v2094_v43 }
  0x67   : > { %v287_v47 = vmax.f32 %v2014_v44, %v286_v45 }
  0x69   : > { %v288_v49 = vmax.f32 %v2018_v46, %v287_v47  ;;  %v2098_v47 = vld [vmem:[%s1916_s24 + $0x1a0] sm:$0xff] }
  0x6a   : > { %3153 = vst [vmem:[#allocation12_spill] sm:$0xff] %v2098_v47 }
  0x6b   : > { %v289_v51 = vmax.f32 %v2022_v48, %v288_v49 }
  0x6d   : > { %v290_v53 = vmax.f32 %v2026_v50, %v289_v51  ;;  %v2102_v51 = vld [vmem:[%s1916_s24 + $0x1a8] sm:$0xff] }
  0x6e   : > { %3154 = vst [vmem:[#allocation13_spill] sm:$0xff] %v2102_v51 }
  0x6f   : > { %v291_v55 = vmax.f32 %v2030_v52, %v290_v53 }
  0x71   : > { %v292_v57 = vmax.f32 %v2034_v54, %v291_v55  ;;  %v2106_v55 = vld [vmem:[%s1916_s24 + $0x1b0] sm:$0xff] }
  0x72   : > { %3155 = vst [vmem:[#allocation14_spill] sm:$0xff] %v2106_v55 }
  0x73   : > { %v293_v59 = vmax.f32 %v2038_v56, %v292_v57 }
  0x75   : > { %v294_v61 = vmax.f32 %v2042_v58, %v293_v59  ;;  %v2110_v59 = vld [vmem:[%s1916_s24 + $0x1b8] sm:$0xff] }
  0x76   : > { %3156 = vst [vmem:[#allocation15_spill] sm:$0xff] %v2110_v59 }
  0x77   : > { %v295_v63 = vmax.f32 %v2046_v60, %v294_v61 }
  0x79   : > { %v296_v5 = vmax.f32 %v2050_v62, %v295_v63  ;;  %v2114_v63 = vld [vmem:[%s1916_s24 + $0x1c0] sm:$0xff] }
  0x7a   : > { %3157 = vst [vmem:[#allocation16_spill] sm:$0xff] %v2114_v63 }
  0x7b   : > { %v297_v9 = vmax.f32 %v2054_v3, %v296_v5 }
  0x7d   : > { %v298_v13 = vmax.f32 %v2058_v7, %v297_v9  ;;  %v2118_v9 = vld [vmem:[%s1916_s24 + $0x1c8] sm:$0xff] }
  0x7e   : > { %3158 = vst [vmem:[#allocation17_spill] sm:$0xff] %v2118_v9 }
  0x7f   : > { %v299_v17 = vmax.f32 %v2062_v11, %v298_v13 }
  0x81   : > { %v300_v21 = vmax.f32 %v2066_v15, %v299_v17  ;;  %v2122_v17 = vld [vmem:[%s1916_s24 + $0x1d0] sm:$0xff] }
  0x82   : > { %3159 = vst [vmem:[#allocation18_spill] sm:$0xff] %v2122_v17 }
  0x83   : > { %v301_v25 = vmax.f32 %v2070_v19, %v300_v21 }
  0x85   : > { %v302_v29 = vmax.f32 %v2074_v23, %v301_v25  ;;  %v2126_v25 = vld [vmem:[%s1916_s24 + $0x1d8] sm:$0xff] }
  0x86   : > { %3160 = vst [vmem:[#allocation19_spill] sm:$0xff] %v2126_v25 }
  0x87   : > { %v303_v33 = vmax.f32 %v2078_v27, %v302_v29 }
  0x89   : > { %v304_v37 = vmax.f32 %v2082_v31, %v303_v33  ;;  %v2130_v33 = vld [vmem:[%s1916_s24 + $0x1e0] sm:$0xff] }
  0x8a   : > { %3161 = vst [vmem:[#allocation20_spill] sm:$0xff] %v2130_v33 }
  0x8b   : > { %v305_v41 = vmax.f32 %v2086_v35, %v304_v37 }
  0x8d   : > { %v306_v45 = vmax.f32 %v2090_v39, %v305_v41  ;;  %v2134_v41 = vld [vmem:[%s1916_s24 + $0x1e8] sm:$0xff] }
  0x8e   : > { %3162 = vst [vmem:[#allocation21_spill] sm:$0xff] %v2134_v41 }
  0x8f   : > { %v307_v49 = vmax.f32 %v2094_v43, %v306_v45 }
  0x91   : > { %v308_v53 = vmax.f32 %v2098_v47, %v307_v49  ;;  %v2138_v49 = vld [vmem:[%s1916_s24 + $0x1f0] sm:$0xff] }
  0x92   : > { %3163 = vst [vmem:[#allocation22_spill] sm:$0xff] %v2138_v49 }
  0x93   : > { %v309_v57 = vmax.f32 %v2102_v51, %v308_v53  ;;  %v260_v51 = vld [vmem:[%s1916_s24 + $0x3f8] sm:$0xff] }
  0x95   : > { %v310_v61 = vmax.f32 %v2106_v55, %v309_v57  ;;  %v2142_v57 = vld [vmem:[%s1916_s24 + $0x1f8] sm:$0xff]  ;;  %v138_v55 = vld [vmem:[%s1916_s24 + $0x28] sm:$0xff] }
  0x96   : > { %3164 = vst [vmem:[#allocation23_spill] sm:$0xff] %v2142_v57 }
  0x97   : > { %v311_v5 = vmax.f32 %v2110_v59, %v310_v61  ;;  %v227_v59 = vld [vmem:[%s1916_s24 + $0x2f0] sm:$0xff] }
  0x99   : > { %v312_v13 = vmax.f32 %v2114_v63, %v311_v5  ;;  %v2146_v5 = vld [vmem:[%s1916_s24 + $0x200] sm:$0xff] }
  0x9a   : > { %3165 = vst [vmem:[#allocation24_spill] sm:$0xff] %v2146_v5 }
  0x9b   : > { %v313_v21 = vmax.f32 %v2118_v9, %v312_v13  ;;  %v224_v9 = vld [vmem:[%s1916_s24 + $0x2d8] sm:$0xff] }
  0x9d   : > { %v314_v29 = vmax.f32 %v2122_v17, %v313_v21  ;;  %v2150_v21 = vld [vmem:[%s1916_s24 + $0x208] sm:$0xff] }
  0x9e   : > { %3166 = vst [vmem:[#allocation25_spill] sm:$0xff] %v2150_v21 }
  0x9f   : > { %v315_v37 = vmax.f32 %v2126_v25, %v314_v29  ;;  %v222_v25 = vld [vmem:[%s1916_s24 + $0x2c8] sm:$0xff] }
  0xa1   : > { %v316_v45 = vmax.f32 %v2130_v33, %v315_v37  ;;  %v2154_v37 = vld [vmem:[%s1916_s24 + $0x210] sm:$0xff] }
  0xa2   : > { %3167 = vst [vmem:[#allocation26_spill] sm:$0xff] %v2154_v37 }
  0xa3   : > { %v317_v53 = vmax.f32 %v2134_v41, %v316_v45  ;;  %v2158_v41 = vld [vmem:[%s1916_s24 + $0x218] sm:$0xff] }
  0xa4   : > { %3168 = vst [vmem:[#allocation27_spill] sm:$0xff] %v2158_v41 }
  0xa5   : > { %v318_v61 = vmax.f32 %v2138_v49, %v317_v53  ;;  %v2162_v49 = vld [vmem:[%s1916_s24 + $0x220] sm:$0xff] }
  0xa6   : > { %3169 = vst [vmem:[#allocation28_spill] sm:$0xff] %v2162_v49 }
  0xa7   : > { %v319_v13 = vmax.f32 %v2142_v57, %v318_v61  ;;  %v2166_v57 = vld [vmem:[%s1916_s24 + $0x228] sm:$0xff] }
  0xa8   : > { %3170 = vst [vmem:[#allocation29_spill] sm:$0xff] %v2166_v57 }
  0xa9   : > { %v320_v29 = vmax.f32 %v2146_v5, %v319_v13  ;;  %v2170_v5 = vld [vmem:[%s1916_s24 + $0x230] sm:$0xff] }
  0xaa   : > { %3171 = vst [vmem:[#allocation30_spill] sm:$0xff] %v2170_v5 }
  0xab   : > { %v321_v45 = vmax.f32 %v2150_v21, %v320_v29  ;;  %v2174_v21 = vld [vmem:[%s1916_s24 + $0x238] sm:$0xff] }
  0xac   : > { %3172 = vst [vmem:[#allocation31_spill] sm:$0xff] %v2174_v21 }
  0xad   : > { %v322_v53 = vmax.f32 %v2154_v37, %v321_v45  ;;  %v2178_v37 = vld [vmem:[%s1916_s24 + $0x240] sm:$0xff] }
  0xae   : > { %3173 = vst [vmem:[#allocation32_spill] sm:$0xff] %v2178_v37 }
  0xaf   : > { %v323_v61 = vmax.f32 %v2158_v41, %v322_v53  ;;  %v2182_v41 = vld [vmem:[%s1916_s24 + $0x248] sm:$0xff] }
  0xb0   : > { %3174 = vst [vmem:[#allocation33_spill] sm:$0xff] %v2182_v41 }
  0xb1   : > { %v324_v13 = vmax.f32 %v2162_v49, %v323_v61  ;;  %v2186_v49 = vld [vmem:[%s1916_s24 + $0x250] sm:$0xff] }
  0xb2   : > { %3175 = vst [vmem:[#allocation34_spill] sm:$0xff] %v2186_v49 }
  0xb3   : > { %v325_v29 = vmax.f32 %v2166_v57, %v324_v13  ;;  %v2190_v57 = vld [vmem:[%s1916_s24 + $0x258] sm:$0xff] }
  0xb4   : > { %3176 = vst [vmem:[#allocation35_spill] sm:$0xff] %v2190_v57 }
  0xb5   : > { %v326_v45 = vmax.f32 %v2170_v5, %v325_v29  ;;  %v2194_v5 = vld [vmem:[%s1916_s24 + $0x260] sm:$0xff] }
  0xb6   : > { %3177 = vst [vmem:[#allocation36_spill] sm:$0xff] %v2194_v5 }
  0xb7   : > { %v327_v53 = vmax.f32 %v2174_v21, %v326_v45  ;;  %v2198_v21 = vld [vmem:[%s1916_s24 + $0x268] sm:$0xff] }
  0xb8   : > { %3178 = vst [vmem:[#allocation37_spill] sm:$0xff] %v2198_v21 }
  0xb9   : > { %v328_v61 = vmax.f32 %v2178_v37, %v327_v53  ;;  %v2202_v37 = vld [vmem:[%s1916_s24 + $0x270] sm:$0xff] }
  0xba   : > { %3179 = vst [vmem:[#allocation38_spill] sm:$0xff] %v2202_v37 }
  0xbb   : > { %v329_v13 = vmax.f32 %v2182_v41, %v328_v61  ;;  %v2206_v41 = vld [vmem:[%s1916_s24 + $0x278] sm:$0xff] }
  0xbc   : > { %3180 = vst [vmem:[#allocation39_spill] sm:$0xff] %v2206_v41 }
  0xbd   : > { %v330_v29 = vmax.f32 %v2186_v49, %v329_v13  ;;  %v2210_v49 = vld [vmem:[%s1916_s24 + $0x280] sm:$0xff] }
  0xbe   : > { %3181 = vst [vmem:[#allocation40_spill] sm:$0xff] %v2210_v49 }
  0xbf   : > { %v331_v45 = vmax.f32 %v2190_v57, %v330_v29  ;;  %v2214_v57 = vld [vmem:[%s1916_s24 + $0x288] sm:$0xff] }
  0xc0   : > { %3182 = vst [vmem:[#allocation41_spill] sm:$0xff] %v2214_v57 }
  0xc1   : > { %v332_v53 = vmax.f32 %v2194_v5, %v331_v45  ;;  %v2218_v5 = vld [vmem:[%s1916_s24 + $0x290] sm:$0xff] }
  0xc2   : > { %3183 = vst [vmem:[#allocation42_spill] sm:$0xff] %v2218_v5 }
  0xc3   : > { %v333_v61 = vmax.f32 %v2198_v21, %v332_v53  ;;  %v2222_v21 = vld [vmem:[%s1916_s24 + $0x298] sm:$0xff] }
  0xc4   : > { %3184 = vst [vmem:[#allocation43_spill] sm:$0xff] %v2222_v21 }
  0xc5   : > { %v334_v13 = vmax.f32 %v2202_v37, %v333_v61  ;;  %v2226_v37 = vld [vmem:[%s1916_s24 + $0x2a0] sm:$0xff] }
  0xc6   : > { %3185 = vst [vmem:[#allocation44_spill] sm:$0xff] %v2226_v37 }
  0xc7   : > { %v335_v29 = vmax.f32 %v2206_v41, %v334_v13  ;;  %v2230_v41 = vld [vmem:[%s1916_s24 + $0x2a8] sm:$0xff] }
  0xc8   : > { %3186 = vst [vmem:[#allocation45_spill] sm:$0xff] %v2230_v41 }
  0xc9   : > { %v336_v45 = vmax.f32 %v2210_v49, %v335_v29  ;;  %v2234_v49 = vld [vmem:[%s1916_s24 + $0x2b0] sm:$0xff] }
  0xca   : > { %3187 = vst [vmem:[#allocation46_spill] sm:$0xff] %v2234_v49 }
  0xcb   : > { %v337_v53 = vmax.f32 %v2214_v57, %v336_v45  ;;  %v220_v57 = vld [vmem:[%s1916_s24 + $0x2b8] sm:$0xff] }
  0xcd   : > { %v338_v61 = vmax.f32 %v2218_v5, %v337_v53  ;;  %v221_v53 = vld [vmem:[%s1916_s24 + $0x2c0] sm:$0xff] }
  0xcf   : > { %v339_v13 = vmax.f32 %v2222_v21, %v338_v61  ;;  %v223_v21 = vld [vmem:[%s1916_s24 + $0x2d0] sm:$0xff] }
  0xd1   : > { %v340_v29 = vmax.f32 %v2226_v37, %v339_v13  ;;  %v225_v37 = vld [vmem:[%s1916_s24 + $0x2e0] sm:$0xff] }
  0xd3   : > { %v341_v45 = vmax.f32 %v2230_v41, %v340_v29  ;;  %v226_v29 = vld [vmem:[%s1916_s24 + $0x2e8] sm:$0xff] }
  0xd5   : > { %v342_v33 = vmax.f32 %v2234_v49, %v341_v45  ;;  %v228_v49 = vld [vmem:[%s1916_s24 + $0x2f8] sm:$0xff] }
  0xd7   : > { %v343_v5 = vmax.f32 %v220_v57, %v342_v33  ;;  %v229_v57 = vld [vmem:[%s1916_s24 + $0x300] sm:$0xff] }
  0xd9   : > { %v344_v61 = vmax.f32 %v221_v53, %v343_v5  ;;  %v230_v53 = vld [vmem:[%s1916_s24 + $0x308] sm:$0xff] }
  0xdb   : > { %v345_v17 = vmax.f32 %v222_v25, %v344_v61  ;;  %v231_v61 = vld [vmem:[%s1916_s24 + $0x310] sm:$0xff] }
  0xdd   : > { %v346_v13 = vmax.f32 %v223_v21, %v345_v17  ;;  %v232_v21 = vld [vmem:[%s1916_s24 + $0x318] sm:$0xff] }
  0xdf   : > { %v347_v63 = vmax.f32 %v224_v9, %v346_v13  ;;  %v233_v13 = vld [vmem:[%s1916_s24 + $0x320] sm:$0xff] }
  0xe1   : > { %v348_v41 = vmax.f32 %v225_v37, %v347_v63  ;;  %v234_v37 = vld [vmem:[%s1916_s24 + $0x328] sm:$0xff] }
  0xe3   : > { %v349_v45 = vmax.f32 %v226_v29, %v348_v41  ;;  %v235_v29 = vld [vmem:[%s1916_s24 + $0x330] sm:$0xff] }
  0xe5   : > { %v350_v33 = vmax.f32 %v227_v59, %v349_v45  ;;  %v236_v45 = vld [vmem:[%s1916_s24 + $0x338] sm:$0xff] }
  0xe7   : > { %v351_v5 = vmax.f32 %v228_v49, %v350_v33  ;;  %v237_v33 = vld [vmem:[%s1916_s24 + $0x340] sm:$0xff] }
  0xe9   : > { %v352_v25 = vmax.f32 %v229_v57, %v351_v5  ;;  %v238_v5 = vld [vmem:[%s1916_s24 + $0x348] sm:$0xff] }
  0xeb   : > { %v353_v17 = vmax.f32 %v230_v53, %v352_v25  ;;  %v239_v25 = vld [vmem:[%s1916_s24 + $0x350] sm:$0xff] }
  0xed   : > { %v354_v9 = vmax.f32 %v231_v61, %v353_v17  ;;  %v240_v17 = vld [vmem:[%s1916_s24 + $0x358] sm:$0xff] }
  0xef   : > { %v355_v63 = vmax.f32 %v232_v21, %v354_v9  ;;  %v241_v9 = vld [vmem:[%s1916_s24 + $0x360] sm:$0xff] }
  0xf1   : > { %v356_v41 = vmax.f32 %v233_v13, %v355_v63  ;;  %v242_v63 = vld [vmem:[%s1916_s24 + $0x368] sm:$0xff] }
  0xf3   : > { %v357_v59 = vmax.f32 %v234_v37, %v356_v41  ;;  %v243_v41 = vld [vmem:[%s1916_s24 + $0x370] sm:$0xff] }
  0xf5   : > { %v358_v49 = vmax.f32 %v235_v29, %v357_v59  ;;  %v244_v59 = vld [vmem:[%s1916_s24 + $0x378] sm:$0xff] }
  0xf7   : > { %v359_v57 = vmax.f32 %v236_v45, %v358_v49  ;;  %v245_v49 = vld [vmem:[%s1916_s24 + $0x380] sm:$0xff] }
  0xf9   : > { %v360_v53 = vmax.f32 %v237_v33, %v359_v57  ;;  %v246_v57 = vld [vmem:[%s1916_s24 + $0x388] sm:$0xff] }
  0xfb   : > { %v361_v61 = vmax.f32 %v238_v5, %v360_v53  ;;  %v247_v53 = vld [vmem:[%s1916_s24 + $0x390] sm:$0xff] }
  0xfd   : > { %v362_v21 = vmax.f32 %v239_v25, %v361_v61  ;;  %v248_v61 = vld [vmem:[%s1916_s24 + $0x398] sm:$0xff] }
  0xff   : > { %v363_v13 = vmax.f32 %v240_v17, %v362_v21  ;;  %v249_v21 = vld [vmem:[%s1916_s24 + $0x3a0] sm:$0xff] }
 0x101   : > { %v364_v37 = vmax.f32 %v241_v9, %v363_v13  ;;  %v250_v13 = vld [vmem:[%s1916_s24 + $0x3a8] sm:$0xff] }
 0x103   : > { %v365_v29 = vmax.f32 %v242_v63, %v364_v37  ;;  %v251_v37 = vld [vmem:[%s1916_s24 + $0x3b0] sm:$0xff] }
 0x105   : > { %v366_v45 = vmax.f32 %v243_v41, %v365_v29  ;;  %v252_v29 = vld [vmem:[%s1916_s24 + $0x3b8] sm:$0xff] }
 0x107   : > { %v367_v33 = vmax.f32 %v244_v59, %v366_v45  ;;  %v253_v45 = vld [vmem:[%s1916_s24 + $0x3c0] sm:$0xff] }
 0x109   : > { %v368_v5 = vmax.f32 %v245_v49, %v367_v33  ;;  %v254_v33 = vld [vmem:[%s1916_s24 + $0x3c8] sm:$0xff] }
 0x10b   : > { %v369_v25 = vmax.f32 %v246_v57, %v368_v5  ;;  %v255_v5 = vld [vmem:[%s1916_s24 + $0x3d0] sm:$0xff] }
 0x10d   : > { %v370_v17 = vmax.f32 %v247_v53, %v369_v25  ;;  %v256_v25 = vld [vmem:[%s1916_s24 + $0x3d8] sm:$0xff] }
 0x10f   : > { %v371_v9 = vmax.f32 %v248_v61, %v370_v17  ;;  %v257_v17 = vld [vmem:[%s1916_s24 + $0x3e0] sm:$0xff] }
 0x111   : > { %v372_v63 = vmax.f32 %v249_v21, %v371_v9  ;;  %v258_v9 = vld [vmem:[%s1916_s24 + $0x3e8] sm:$0xff] }
 0x113   : > { %v373_v41 = vmax.f32 %v250_v13, %v372_v63  ;;  %v133_v63 = vld [vmem:[%s1916_s24] sm:$0xff] }
 0x115   : > { %v374_v59 = vmax.f32 %v251_v37, %v373_v41  ;;  %v137_v37 = vld [vmem:[%s1916_s24 + $0x20] sm:$0xff]  ;;  %v259_v41 = vld [vmem:[%s1916_s24 + $0x3f0] sm:$0xff] }
 0x117   : > { %v375_v49 = vmax.f32 %v252_v29, %v374_v59  ;;  %v134_v59 = vld [vmem:[%s1916_s24 + $0x8] sm:$0xff] }
 0x118   : > { %v262_v43 = vmax.f32 %v134_v59, %v138_v55 }
 0x119   : > { %v376_v57 = vmax.f32 %v253_v45, %v375_v49  ;;  %v261_v49 = vmax.f32 %v133_v63, %v137_v37 }
 0x11b   : > { %v377_v53 = vmax.f32 %v254_v33, %v376_v57  ;;  %v135_v33 = vld [vmem:[%s1916_s24 + $0x10] sm:$0xff] }
 0x11c   : > { %v139_v57 = vld [vmem:[%s1916_s24 + $0x30] sm:$0xff] }
 0x11d   : > { %v378_v61 = vmax.f32 %v255_v5, %v377_v53  ;;  %v136_v5 = vld [vmem:[%s1916_s24 + $0x18] sm:$0xff] }
 0x11e   : > { %v140_v53 = vld [vmem:[%s1916_s24 + $0x38] sm:$0xff] }
 0x11f   : > { %v379_v21 = vmax.f32 %v256_v25, %v378_v61  ;;  %v263_v61 = vmax.f32 %v135_v33, %v139_v57  ;;  %v264_v35 = vmax.f32 %v136_v5, %v140_v53 }
 0x121   : > { %v380_v13 = vmax.f32 %v257_v17, %v379_v21 }
 0x123   : > { %v381_v29 = vmax.f32 %v258_v9, %v380_v13 }
 0x125   : > { %v382_v45 = vmax.f32 %v259_v41, %v381_v29 }
 0x127   : > { %v383_v47 = vmax.f32 %v260_v51, %v382_v45 }
 0x129   : > { %v384_v25 = vmax.f32 %v261_v49, %v383_v47 }
 0x12b   : > { %v385_v39 = vmax.f32 %v262_v43, %v384_v25 }
 0x12d   : > { %v386_v17 = vmax.f32 %v263_v61, %v385_v39 }
 0x12f   : > { %v387_v21 = vmax.f32 %v264_v35, %v386_v17 }
 0x131   : > { %388 = vmax.xlane.f32.xlu0 %v387_v21 }
 0x1be   : > { %v2287_v31 = vpop.xlane.xlu0 %388 }
 0x1bf   : > { %v390_v9 = vsub.f32 %v133_v63, %v2287_v31  ;;  %v391_v13 = vsub.f32 %v134_v59, %v2287_v31  ;;  %v392_v29 = vsub.f32 %v135_v33, %v2287_v31  ;;  %v393_v45 = vsub.f32 %v136_v5, %v2287_v31 }
 0x1c0   : > { %v394_v47 = vsub.f32 %v137_v37, %v2287_v31  ;;  %v395_v35 = vsub.f32 %v138_v55, %v2287_v31  ;;  %v396_v49 = vsub.f32 %v139_v57, %v2287_v31  ;;  %v397_v59 = vsub.f32 %v140_v53, %v2287_v31 }
 0x1c1   : > { %v518_v41 = vmul.f32 1.442695, %v390_v9  ;;  %v520_v51 = vmul.f32 1.442695, %v391_v13  ;;  %v522_v43 = vmul.f32 1.442695, %v392_v29  ;;  %v398_v33 = vsub.f32 %v1923_v0, %v2287_v31 }
 0x1c2   : > { %v524_v39 = vmul.f32 1.442695, %v393_v45  ;;  %v526_v63 = vmul.f32 1.442695, %v394_v47  ;;  %v528_v25 = vmul.f32 1.442695, %v395_v35  ;;  %v399_v17 = vsub.f32 %v1926_v1, %v2287_v31 }
 0x1c3   : > { %1309 = vpow2.f32 %v518_v41  ;;  %v530_v5 = vmul.f32 1.442695, %v396_v49  ;;  %v532_v55 = vmul.f32 1.442695, %v397_v59  ;;  %v400_v57 = vsub.f32 %v1929_v2, %v2287_v31 }
 0x1c4   : > { %1311 = vpow2.f32 %v520_v51  ;;  %v534_v21 = vmul.f32 1.442695, %v398_v33  ;;  %v401_v13 = vsub.f32 %v1934_v4, %v2287_v31  ;;  %v536_v0 = vmul.f32 1.442695, %v399_v17 }
 0x1c5   : > { %1313 = vpow2.f32 %v522_v43  ;;  %v402_v51 = vsub.f32 %v1938_v6, %v2287_v31  ;;  %v538_v1 = vmul.f32 1.442695, %v400_v57  ;;  %v403_v2 = vsub.f32 %v1942_v8, %v2287_v31 }
 0x1c6   : > { %1315 = vpow2.f32 %v524_v39  ;;  %v540_v43 = vmul.f32 1.442695, %v401_v13  ;;  %v404_v4 = vsub.f32 %v1946_v10, %v2287_v31  ;;  %v405_v6 = vsub.f32 %v1950_v12, %v2287_v31 }
 0x1c7   : > { %1317 = vpow2.f32 %v526_v63  ;;  %v542_v49 = vmul.f32 1.442695, %v402_v51  ;;  %v406_v8 = vsub.f32 %v1954_v14, %v2287_v31  ;;  %v407_v10 = vsub.f32 %v1958_v16, %v2287_v31 }
 0x1c8   : > { %1319 = vpow2.f32 %v528_v25  ;;  %v544_v25 = vmul.f32 1.442695, %v403_v2  ;;  %v408_v12 = vsub.f32 %v1962_v18, %v2287_v31  ;;  %v409_v14 = vsub.f32 %v1966_v20, %v2287_v31 }
 0x1c9   : > { %1321 = vpow2.f32 %v530_v5  ;;  %v410_v16 = vsub.f32 %v1970_v22, %v2287_v31  ;;  %v411_v18 = vsub.f32 %v1974_v24, %v2287_v31  ;;  %v412_v20 = vsub.f32 %v1978_v26, %v2287_v31 }
 0x1ca   : > { %1323 = vpow2.f32 %v532_v55  ;;  %v548_v55 = vmul.f32 1.442695, %v405_v6  ;;  %v554_v51 = vmul.f32 1.442695, %v408_v12  ;;  %v413_v22 = vsub.f32 %v1982_v28, %v2287_v31 }
 0x1cb   : > { %1325 = vpow2.f32 %v534_v21  ;;  %v414_v24 = vsub.f32 %v1986_v30, %v2287_v31  ;;  %v562_v6 = vmul.f32 1.442695, %v412_v20  ;;  %v415_v26 = vsub.f32 %v1990_v32, %v2287_v31 }
 0x1cc   : > { %1327 = vpow2.f32 %v536_v0  ;;  %v552_v0 = vmul.f32 1.442695, %v407_v10  ;;  %v416_v28 = vsub.f32 %v1994_v34, %v2287_v31  ;;  %v417_v30 = vsub.f32 %v1998_v36, %v2287_v31 }
 0x1cd   : > { %v1310_v61 = vpop.eup %1309  ;;  %1329 = vpow2.f32 %v538_v1  ;;  %v418_v32 = vsub.f32 %v2002_v38, %v2287_v31  ;;  %v419_v34 = vsub.f32 %v2006_v40, %v2287_v31  ;;  %v420_v36 = vsub.f32 %v2010_v42, %v2287_v31 }
 0x1ce   : > { %v1312_v37 = vpop.eup %1311  ;;  %1331 = vpow2.f32 %v540_v43  ;;  %v570_v12 = vmul.f32 1.442695, %v416_v28  ;;  %v421_v38 = vsub.f32 %v2014_v44, %v2287_v31  ;;  %v422_v40 = vsub.f32 %v2018_v46, %v2287_v31 }
 0x1cf   : > { %v774_v53 = vadd.f32 %v1312_v37, %v1310_v61  ;;  %v1314_v9 = vpop.eup %1313  ;;  %1333 = vpow2.f32 %v542_v49  ;;  %v546_v61 = vmul.f32 1.442695, %v404_v4  ;;  %v560_v49 = vmul.f32 1.442695, %v411_v18 }
 0x1d0   : > { %v1316_v29 = vpop.eup %1315  ;;  %1335 = vpow2.f32 %v544_v25  ;;  %v578_v18 = vmul.f32 1.442695, %v420_v36  ;;  %v423_v42 = vsub.f32 %v2022_v48, %v2287_v31  ;;  %v424_v44 = vsub.f32 %v2026_v50, %v2287_v31 }
 0x1d1   : > { %v775_v41 = vadd.f32 %v1314_v9, %v774_v53  ;;  %v1318_v47 = vpop.eup %1317  ;;  %1337 = vpow2.f32 %v546_v61  ;;  %v550_v53 = vmul.f32 1.442695, %v406_v8  ;;  %v425_v46 = vsub.f32 %v2030_v52, %v2287_v31 }
 0x1d2   : > { %v1320_v39 = vpop.eup %1319  ;;  %1339 = vpow2.f32 %v548_v55  ;;  %v568_v55 = vmul.f32 1.442695, %v415_v26  ;;  %v426_v48 = vsub.f32 %v2034_v54, %v2287_v31  ;;  %v427_v50 = vsub.f32 %v2038_v56, %v2287_v31 }
 0x1d3   : > { %v776_v45 = vadd.f32 %v1316_v29, %v775_v41  ;;  %v1322_v59 = vpop.eup %1321  ;;  %1341 = vpow2.f32 %v550_v53  ;;  %v428_v52 = vsub.f32 %v2042_v58, %v2287_v31  ;;  %v429_v54 = vsub.f32 %v2046_v60, %v2287_v31 }
 0x1d4   : > { %v1324_v5 = vpop.eup %1323  ;;  %1343 = vpow2.f32 %v552_v0  ;;  %v430_v56 = vsub.f32 %v2050_v62, %v2287_v31  ;;  %v431_v58 = vsub.f32 %v2054_v3, %v2287_v31  ;;  %v432_v60 = vsub.f32 %v2058_v7, %v2287_v31 }
 0x1d5   : > { %v777_v35 = vadd.f32 %v1318_v47, %v776_v45  ;;  %v1326_v17 = vpop.eup %1325  ;;  %v556_v47 = vmul.f32 1.442695, %v409_v14  ;;  %1345 = vpow2.f32 %v554_v51  ;;  %v576_v51 = vmul.f32 1.442695, %v419_v34 }
 0x1d6   : > { %v1328_v21 = vpop.eup %1327  ;;  %v433_v62 = vsub.f32 %v2062_v11, %v2287_v31  ;;  %v434_v3 = vsub.f32 %v2066_v15, %v2287_v31  ;;  %v602_v36 = vmul.f32 1.442695, %v432_v60  ;;  %v435_v7 = vsub.f32 %v2070_v19, %v2287_v31  ;;  %v3188_v19 = vld [vmem:[#allocation8_spill] sm:$0xff] }
 0x1d7   : > { %v778_v63 = vadd.f32 %v1320_v39, %v777_v35  ;;  %v1330_v13 = vpop.eup %1329  ;;  %v558_v35 = vmul.f32 1.442695, %v410_v16  ;;  %1347 = vpow2.f32 %v556_v47  ;;  %v436_v11 = vsub.f32 %v2074_v23, %v2287_v31  ;;  %v3189_v23 = vld [vmem:[#allocation9_spill] sm:$0xff] }
 0x1d8   : > { %v1332_v29 = vpop.eup %1331  ;;  %v437_v15 = vsub.f32 %v2078_v27, %v2287_v31  ;;  %v3190_v27 = vld [vmem:[#allocation10_spill] sm:$0xff] }
 0x1d9   : > { %v779_v33 = vadd.f32 %v1322_v59, %v778_v63  ;;  %v1334_v45 = vpop.eup %1333  ;;  %1349 = vpow2.f32 %v558_v35 }
 0x1da   : > { %v1336_v43 = vpop.eup %1335  ;;  %1351 = vpow2.f32 %v560_v49  ;;  %v584_v49 = vmul.f32 1.442695, %v423_v42  ;;  %v438_v42 = vsub.f32 %v3188_v19, %v2287_v31 }
 0x1db   : > { %v780_v37 = vadd.f32 %v1324_v5, %v779_v33  ;;  %v1338_v4 = vpop.eup %1337  ;;  %v564_v5 = vmul.f32 1.442695, %v413_v22  ;;  %1353 = vpow2.f32 %v562_v6 }
 0x1dc   : > { %v1340_v59 = vpop.eup %1339 }
 0x1dd   : > { %v781_v57 = vadd.f32 %v1326_v17, %v780_v37  ;;  %v1342_v33 = vpop.eup %1341  ;;  %v566_v37 = vmul.f32 1.442695, %v414_v24  ;;  %1355 = vpow2.f32 %v564_v5  ;;  %v586_v24 = vmul.f32 1.442695, %v424_v44 }
 0x1de   : > { %v1344_v61 = vpop.eup %1343  ;;  %v439_v44 = vsub.f32 %v3189_v23, %v2287_v31 }
 0x1df   : > { %v782_v9 = vadd.f32 %v1328_v21, %v781_v57  ;;  %v1346_v10 = vpop.eup %1345  ;;  %1357 = vpow2.f32 %v566_v37  ;;  %v592_v37 = vmul.f32 1.442695, %v427_v50 }
 0x1e0   : > { %1359 = vpow2.f32 %v568_v55 }
 0x1e1   : > { %v783_v41 = vadd.f32 %v1330_v13, %v782_v9  ;;  %v1348_v21 = vpop.eup %1347  ;;  %v572_v13 = vmul.f32 1.442695, %v417_v30  ;;  %1361 = vpow2.f32 %v570_v12  ;;  %v594_v30 = vmul.f32 1.442695, %v428_v52 }
 0x1e3   : > { %v784_v1 = vadd.f32 %v1332_v29, %v783_v41  ;;  %v1350_v9 = vpop.eup %1349  ;;  %v574_v41 = vmul.f32 1.442695, %v418_v32  ;;  %1363 = vpow2.f32 %v572_v13  ;;  %v600_v13 = vmul.f32 1.442695, %v431_v58  ;;  %v3195_v58 = vld [vmem:[#allocation15_spill] sm:$0xff] }
 0x1e4   : > { %v1352_v0 = vpop.eup %1351 }
 0x1e5   : > { %v785_v2 = vadd.f32 %v1334_v45, %v784_v1  ;;  %v1354_v16 = vpop.eup %1353  ;;  %1365 = vpow2.f32 %v574_v41 }
 0x1e6   : > { %1367 = vpow2.f32 %v576_v51 }
 0x1e7   : > { %v786_v39 = vadd.f32 %v1336_v43, %v785_v2  ;;  %v1356_v45 = vpop.eup %1355  ;;  %v580_v43 = vmul.f32 1.442695, %v421_v38  ;;  %1369 = vpow2.f32 %v578_v18  ;;  %v608_v18 = vmul.f32 1.442695, %v435_v7 }
 0x1e9   : > { %v787_v63 = vadd.f32 %v1338_v4, %v786_v39  ;;  %v1358_v2 = vpop.eup %1357  ;;  %v582_v39 = vmul.f32 1.442695, %v422_v40  ;;  %1371 = vpow2.f32 %v580_v43  ;;  %v610_v43 = vmul.f32 1.442695, %v436_v11  ;;  %v3199_v11 = vld [vmem:[#allocation19_spill] sm:$0xff] }
 0x1ea   : > { %v1360_v35 = vpop.eup %1359 }
 0x1eb   : > { %v788_v25 = vadd.f32 %v1340_v59, %v787_v63  ;;  %v1362_v22 = vpop.eup %1361  ;;  %1373 = vpow2.f32 %v582_v39  ;;  %v612_v39 = vmul.f32 1.442695, %v437_v15 }
 0x1ec   : > { %1375 = vpow2.f32 %v584_v49  ;;  %v614_v49 = vmul.f32 1.442695, %v438_v42 }
 0x1ed   : > { %v789_v8 = vadd.f32 %v1342_v33, %v788_v25  ;;  %v1364_v59 = vpop.eup %1363  ;;  %v588_v33 = vmul.f32 1.442695, %v425_v46  ;;  %1377 = vpow2.f32 %v586_v24  ;;  %v440_v46 = vsub.f32 %v3190_v27, %v2287_v31 }
 0x1ef   : > { %v790_v17 = vadd.f32 %v1344_v61, %v789_v8  ;;  %v1366_v25 = vpop.eup %1365  ;;  %v590_v8 = vmul.f32 1.442695, %v426_v48  ;;  %1379 = vpow2.f32 %v588_v33  ;;  %v3191_v48 = vld [vmem:[#allocation11_spill] sm:$0xff]  ;;  %v3192_v33 = vld [vmem:[#allocation12_spill] sm:$0xff] }
 0x1f0   : > { %v1368_v5 = vpop.eup %1367  ;;  %v441_v24 = vsub.f32 %v3191_v48, %v2287_v31 }
 0x1f1   : > { %v791_v57 = vadd.f32 %v1346_v10, %v790_v17  ;;  %v1370_v28 = vpop.eup %1369  ;;  %1381 = vpow2.f32 %v590_v8 }
 0x1f2   : > { %1383 = vpow2.f32 %v592_v37 }
 0x1f3   : > { %v792_v53 = vadd.f32 %v1348_v21, %v791_v57  ;;  %v1372_v10 = vpop.eup %1371  ;;  %v596_v21 = vmul.f32 1.442695, %v429_v54  ;;  %1385 = vpow2.f32 %v594_v30  ;;  %v620_v54 = vmul.f32 1.442695, %v441_v24 }
 0x1f5   : > { %v793_v14 = vadd.f32 %v1350_v9, %v792_v53  ;;  %v1374_v57 = vpop.eup %1373  ;;  %v598_v53 = vmul.f32 1.442695, %v430_v56  ;;  %1387 = vpow2.f32 %v596_v21  ;;  %v445_v21 = vsub.f32 %v3195_v58, %v2287_v31 }
 0x1f6   : > { %v1376_v12 = vpop.eup %1375 }
 0x1f7   : > { %v794_v29 = vadd.f32 %v1352_v0, %v793_v14  ;;  %v1378_v34 = vpop.eup %1377  ;;  %1389 = vpow2.f32 %v598_v53  ;;  %v3196_v53 = vld [vmem:[#allocation16_spill] sm:$0xff] }
 0x1f8   : > { %1391 = vpow2.f32 %v600_v13 }
 0x1f9   : > { %v795_v1 = vadd.f32 %v1354_v16, %v794_v29  ;;  %v1380_v0 = vpop.eup %1379  ;;  %v604_v16 = vmul.f32 1.442695, %v433_v62  ;;  %1393 = vpow2.f32 %v602_v36 }
 0x1fb   : > { %v796_v47 = vadd.f32 %v1356_v45, %v795_v1  ;;  %v1382_v29 = vpop.eup %1381  ;;  %v606_v1 = vmul.f32 1.442695, %v434_v3  ;;  %1395 = vpow2.f32 %v604_v16  ;;  %v628_v3 = vmul.f32 1.442695, %v445_v21 }
 0x1fc   : > { %v1384_v51 = vpop.eup %1383 }
 0x1fd   : > { %v797_v20 = vadd.f32 %v1358_v2, %v796_v47  ;;  %v1386_v40 = vpop.eup %1385  ;;  %1397 = vpow2.f32 %v606_v1  ;;  %v449_v1 = vsub.f32 %v3199_v11, %v2287_v31 }
 0x1fe   : > { %1399 = vpow2.f32 %v608_v18  ;;  %v3200_v18 = vld [vmem:[#allocation20_spill] sm:$0xff] }
 0x1ff   : > { %v798_v4 = vadd.f32 %v1360_v35, %v797_v20  ;;  %v1388_v2 = vpop.eup %1387  ;;  %1401 = vpow2.f32 %v610_v43  ;;  %v3201_v43 = vld [vmem:[#allocation21_spill] sm:$0xff] }
 0x200   : > { %1403 = vpow2.f32 %v612_v39  ;;  %v3202_v39 = vld [vmem:[#allocation22_spill] sm:$0xff] }
 0x201   : > { %v799_v63 = vadd.f32 %v1362_v22, %v798_v4  ;;  %v1390_v35 = vpop.eup %1389  ;;  %1405 = vpow2.f32 %v614_v49  ;;  %v3203_v49 = vld [vmem:[#allocation23_spill] sm:$0xff] }
 0x202   : > { %v1392_v22 = vpop.eup %1391 }
 0x203   : > { %v800_v6 = vadd.f32 %v1364_v59, %v799_v63  ;;  %v1394_v59 = vpop.eup %1393 }
 0x205   : > { %v801_v26 = vadd.f32 %v1366_v25, %v800_v6  ;;  %v616_v6 = vmul.f32 1.442695, %v439_v44  ;;  %v1396_v50 = vpop.eup %1395 }
 0x207   : > { %v802_v61 = vadd.f32 %v1368_v5, %v801_v26  ;;  %v442_v26 = vsub.f32 %v3192_v33, %v2287_v31  ;;  %v618_v5 = vmul.f32 1.442695, %v440_v46  ;;  %v1398_v8 = vpop.eup %1397  ;;  %1407 = vpow2.f32 %v616_v6  ;;  %v3204_v6 = vld [vmem:[#allocation24_spill] sm:$0xff] }
 0x209   : > { %v803_v17 = vadd.f32 %v1370_v28, %v802_v61  ;;  %v3193_v61 = vld [vmem:[#allocation13_spill] sm:$0xff]  ;;  %1409 = vpow2.f32 %v618_v5  ;;  %v622_v30 = vmul.f32 1.442695, %v442_v26 }
 0x20a   : > { %v443_v28 = vsub.f32 %v3193_v61, %v2287_v31  ;;  %1411 = vpow2.f32 %v620_v54  ;;  %v3205_v5 = vld [vmem:[#allocation25_spill] sm:$0xff]  ;;  %v3206_v54 = vld [vmem:[#allocation26_spill] sm:$0xff] }
 0x20b   : > { %v804_v55 = vadd.f32 %v1372_v10, %v803_v17  ;;  %v1400_v17 = vpop.eup %1399  ;;  %v3194_v10 = vld [vmem:[#allocation14_spill] sm:$0xff]  ;;  %1413 = vpow2.f32 %v622_v30  ;;  %v3207_v30 = vld [vmem:[#allocation27_spill] sm:$0xff] }
 0x20c   : > { %v444_v56 = vsub.f32 %v3194_v10, %v2287_v31 }
 0x20d   : > { %v805_v32 = vadd.f32 %v1374_v57, %v804_v55  ;;  %v1402_v57 = vpop.eup %1401 }
 0x20e   : > { %v1404_v60 = vpop.eup %1403 }
 0x20f   : > { %v806_v9 = vadd.f32 %v1376_v12, %v805_v32  ;;  %v624_v32 = vmul.f32 1.442695, %v443_v28  ;;  %v1406_v13 = vpop.eup %1405 }
 0x211   : > { %v807_v14 = vadd.f32 %v1378_v34, %v806_v9  ;;  %v446_v9 = vsub.f32 %v3196_v53, %v2287_v31  ;;  %v626_v34 = vmul.f32 1.442695, %v444_v56  ;;  %1415 = vpow2.f32 %v624_v32  ;;  %v3208_v32 = vld [vmem:[#allocation28_spill] sm:$0xff] }
 0x213   : > { %v808_v41 = vadd.f32 %v1380_v0, %v807_v14  ;;  %v3197_v14 = vld [vmem:[#allocation17_spill] sm:$0xff]  ;;  %1417 = vpow2.f32 %v626_v34  ;;  %v630_v16 = vmul.f32 1.442695, %v446_v9 }
 0x214   : > { %v447_v0 = vsub.f32 %v3197_v14, %v2287_v31  ;;  %1419 = vpow2.f32 %v628_v3  ;;  %v3209_v34 = vld [vmem:[#allocation29_spill] sm:$0xff]  ;;  %v3210_v3 = vld [vmem:[#allocation30_spill] sm:$0xff] }
 0x215   : > { %v809_v38 = vadd.f32 %v1382_v29, %v808_v41  ;;  %v1408_v41 = vpop.eup %1407  ;;  %v3198_v29 = vld [vmem:[#allocation18_spill] sm:$0xff]  ;;  %1421 = vpow2.f32 %v630_v16  ;;  %v3211_v16 = vld [vmem:[#allocation31_spill] sm:$0xff] }
 0x216   : > { %v448_v7 = vsub.f32 %v3198_v29, %v2287_v31 }
 0x217   : > { %v810_v45 = vadd.f32 %v1384_v51, %v809_v38  ;;  %v1410_v51 = vpop.eup %1409 }
 0x218   : > { %v1412_v15 = vpop.eup %1411 }
 0x219   : > { %v811_v47 = vadd.f32 %v1386_v40, %v810_v45  ;;  %v632_v45 = vmul.f32 1.442695, %v447_v0  ;;  %v1414_v42 = vpop.eup %1413 }
 0x21b   : > { %v812_v20 = vadd.f32 %v1388_v2, %v811_v47  ;;  %v450_v47 = vsub.f32 %v3200_v18, %v2287_v31  ;;  %v634_v2 = vmul.f32 1.442695, %v448_v7  ;;  %1423 = vpow2.f32 %v632_v45  ;;  %v1416_v44 = vpop.eup %1415  ;;  %v3212_v45 = vld [vmem:[#allocation32_spill] sm:$0xff] }
 0x21d   : > { %v813_v4 = vadd.f32 %v1390_v35, %v812_v20  ;;  %v451_v20 = vsub.f32 %v3201_v43, %v2287_v31  ;;  %v636_v35 = vmul.f32 1.442695, %v449_v1  ;;  %1425 = vpow2.f32 %v634_v2  ;;  %v1418_v46 = vpop.eup %1417  ;;  %v3213_v2 = vld [vmem:[#allocation33_spill] sm:$0xff] }
 0x21e   : > { %v1420_v24 = vpop.eup %1419 }
 0x21f   : > { %v814_v63 = vadd.f32 %v1392_v22, %v813_v4  ;;  %v452_v4 = vsub.f32 %v3202_v39, %v2287_v31  ;;  %v638_v22 = vmul.f32 1.442695, %v450_v47  ;;  %1427 = vpow2.f32 %v636_v35  ;;  %v1422_v26 = vpop.eup %1421  ;;  %v3214_v35 = vld [vmem:[#allocation34_spill] sm:$0xff] }
 0x221   : > { %v815_v25 = vadd.f32 %v1394_v59, %v814_v63  ;;  %v453_v63 = vsub.f32 %v3203_v49, %v2287_v31  ;;  %v640_v59 = vmul.f32 1.442695, %v451_v20  ;;  %1429 = vpow2.f32 %v638_v22  ;;  %v3215_v22 = vld [vmem:[#allocation35_spill] sm:$0xff] }
 0x223   : > { %v816_v52 = vadd.f32 %v1396_v50, %v815_v25  ;;  %v454_v25 = vsub.f32 %v3204_v6, %v2287_v31  ;;  %v642_v50 = vmul.f32 1.442695, %v452_v4  ;;  %1431 = vpow2.f32 %v640_v59  ;;  %v3216_v59 = vld [vmem:[#allocation36_spill] sm:$0xff] }
 0x225   : > { %v817_v37 = vadd.f32 %v1398_v8, %v816_v52  ;;  %v455_v52 = vsub.f32 %v3205_v5, %v2287_v31  ;;  %v644_v8 = vmul.f32 1.442695, %v453_v63  ;;  %v1424_v28 = vpop.eup %1423  ;;  %1433 = vpow2.f32 %v642_v50  ;;  %v3217_v50 = vld [vmem:[#allocation37_spill] sm:$0xff] }
 0x227   : > { %v818_v55 = vadd.f32 %v1400_v17, %v817_v37  ;;  %v456_v37 = vsub.f32 %v3206_v54, %v2287_v31  ;;  %v646_v17 = vmul.f32 1.442695, %v454_v25  ;;  %v1426_v56 = vpop.eup %1425  ;;  %1435 = vpow2.f32 %v644_v8  ;;  %v3218_v8 = vld [vmem:[#allocation38_spill] sm:$0xff] }
 0x229   : > { %v819_v12 = vadd.f32 %v1402_v57, %v818_v55  ;;  %v457_v55 = vsub.f32 %v3207_v30, %v2287_v31  ;;  %v648_v57 = vmul.f32 1.442695, %v455_v52  ;;  %v1428_v21 = vpop.eup %1427  ;;  %1437 = vpow2.f32 %v646_v17  ;;  %v3219_v17 = vld [vmem:[#allocation39_spill] sm:$0xff] }
 0x22b   : > { %v820_v62 = vadd.f32 %v1404_v60, %v819_v12  ;;  %v458_v12 = vsub.f32 %v3208_v32, %v2287_v31  ;;  %v650_v60 = vmul.f32 1.442695, %v456_v37  ;;  %v1430_v9 = vpop.eup %1429  ;;  %1439 = vpow2.f32 %v648_v57  ;;  %v3220_v57 = vld [vmem:[#allocation40_spill] sm:$0xff] }
 0x22d   : > { %v821_v36 = vadd.f32 %v1406_v13, %v820_v62  ;;  %v459_v62 = vsub.f32 %v3209_v34, %v2287_v31  ;;  %v652_v13 = vmul.f32 1.442695, %v457_v55  ;;  %v1432_v0 = vpop.eup %1431  ;;  %1441 = vpow2.f32 %v650_v60  ;;  %v3221_v60 = vld [vmem:[#allocation41_spill] sm:$0xff] }
 0x22f   : > { %v822_v38 = vadd.f32 %v1408_v41, %v821_v36  ;;  %v460_v36 = vsub.f32 %v3210_v3, %v2287_v31  ;;  %v654_v41 = vmul.f32 1.442695, %v458_v12  ;;  %v1434_v7 = vpop.eup %1433  ;;  %1443 = vpow2.f32 %v652_v13  ;;  %v3222_v13 = vld [vmem:[#allocation42_spill] sm:$0xff] }
 0x231   : > { %v823_v40 = vadd.f32 %v1410_v51, %v822_v38  ;;  %v461_v38 = vsub.f32 %v3211_v16, %v2287_v31  ;;  %v656_v51 = vmul.f32 1.442695, %v459_v62  ;;  %v1436_v1 = vpop.eup %1435  ;;  %1445 = vpow2.f32 %v654_v41  ;;  %v3223_v41 = vld [vmem:[#allocation43_spill] sm:$0xff] }
 0x233   : > { %v824_v19 = vadd.f32 %v1412_v15, %v823_v40  ;;  %v462_v40 = vsub.f32 %v3212_v45, %v2287_v31  ;;  %v658_v15 = vmul.f32 1.442695, %v460_v36  ;;  %v1438_v47 = vpop.eup %1437  ;;  %1447 = vpow2.f32 %v656_v51  ;;  %v3224_v51 = vld [vmem:[#allocation44_spill] sm:$0xff] }
 0x235   : > { %v825_v23 = vadd.f32 %v1414_v42, %v824_v19  ;;  %v463_v19 = vsub.f32 %v3213_v2, %v2287_v31  ;;  %v660_v42 = vmul.f32 1.442695, %v461_v38  ;;  %v1440_v20 = vpop.eup %1439  ;;  %1449 = vpow2.f32 %v658_v15  ;;  %v3225_v15 = vld [vmem:[#allocation45_spill] sm:$0xff] }
 0x237   : > { %v826_v27 = vadd.f32 %v1416_v44, %v825_v23  ;;  %v464_v23 = vsub.f32 %v3214_v35, %v2287_v31  ;;  %v662_v44 = vmul.f32 1.442695, %v462_v40  ;;  %v1442_v4 = vpop.eup %1441  ;;  %1451 = vpow2.f32 %v660_v42  ;;  %v3226_v42 = vld [vmem:[#allocation46_spill] sm:$0xff] }
 0x239   : > { %v827_v48 = vadd.f32 %v1418_v46, %v826_v27  ;;  %v465_v27 = vsub.f32 %v3215_v22, %v2287_v31  ;;  %v664_v46 = vmul.f32 1.442695, %v463_v19  ;;  %v1444_v63 = vpop.eup %1443  ;;  %1453 = vpow2.f32 %v662_v44  ;;  %v2456_v44 = vld [vmem:[%s1916_s24 + $0x2b8] sm:$0xff] }
 0x23b   : > { %v828_v33 = vadd.f32 %v1420_v24, %v827_v48  ;;  %v466_v48 = vsub.f32 %v3216_v59, %v2287_v31  ;;  %v666_v24 = vmul.f32 1.442695, %v464_v23  ;;  %v1446_v25 = vpop.eup %1445  ;;  %1455 = vpow2.f32 %v664_v46  ;;  %v2461_v46 = vld [vmem:[%s1916_s24 + $0x2c0] sm:$0xff] }
 0x23d   : > { %v829_v61 = vadd.f32 %v1422_v26, %v828_v33  ;;  %v467_v33 = vsub.f32 %v3217_v50, %v2287_v31  ;;  %v668_v26 = vmul.f32 1.442695, %v465_v27  ;;  %v1448_v52 = vpop.eup %1447  ;;  %1457 = vpow2.f32 %v666_v24  ;;  %v2466_v24 = vld [vmem:[%s1916_s24 + $0x2c8] sm:$0xff] }
 0x23f   : > { %v830_v10 = vadd.f32 %v1424_v28, %v829_v61  ;;  %v468_v61 = vsub.f32 %v3218_v8, %v2287_v31  ;;  %v670_v28 = vmul.f32 1.442695, %v466_v48  ;;  %v1450_v37 = vpop.eup %1449  ;;  %1459 = vpow2.f32 %v668_v26  ;;  %v2471_v26 = vld [vmem:[%s1916_s24 + $0x2d0] sm:$0xff] }
 0x241   : > { %v831_v58 = vadd.f32 %v1426_v56, %v830_v10  ;;  %v469_v10 = vsub.f32 %v3219_v17, %v2287_v31  ;;  %v672_v56 = vmul.f32 1.442695, %v467_v33  ;;  %v1452_v55 = vpop.eup %1451  ;;  %1461 = vpow2.f32 %v670_v28  ;;  %v2476_v28 = vld [vmem:[%s1916_s24 + $0x2d8] sm:$0xff] }
 0x243   : > { %v832_v53 = vadd.f32 %v1428_v21, %v831_v58  ;;  %v470_v58 = vsub.f32 %v3220_v57, %v2287_v31  ;;  %v674_v21 = vmul.f32 1.442695, %v468_v61  ;;  %v1454_v12 = vpop.eup %1453  ;;  %1463 = vpow2.f32 %v672_v56  ;;  %v2481_v56 = vld [vmem:[%s1916_s24 + $0x2e0] sm:$0xff] }
 0x245   : > { %v833_v14 = vadd.f32 %v1430_v9, %v832_v53  ;;  %v471_v53 = vsub.f32 %v3221_v60, %v2287_v31  ;;  %v676_v9 = vmul.f32 1.442695, %v469_v10  ;;  %v1456_v62 = vpop.eup %1455  ;;  %1465 = vpow2.f32 %v674_v21  ;;  %v2486_v21 = vld [vmem:[%s1916_s24 + $0x2e8] sm:$0xff] }
 0x247   : > { %v834_v29 = vadd.f32 %v1432_v0, %v833_v14  ;;  %v472_v14 = vsub.f32 %v3222_v13, %v2287_v31  ;;  %v678_v0 = vmul.f32 1.442695, %v470_v58  ;;  %v1458_v36 = vpop.eup %1457  ;;  %1467 = vpow2.f32 %v676_v9  ;;  %v2491_v9 = vld [vmem:[%s1916_s24 + $0x2f0] sm:$0xff] }
 0x249   : > { %v835_v11 = vadd.f32 %v1434_v7, %v834_v29  ;;  %v473_v29 = vsub.f32 %v3223_v41, %v2287_v31  ;;  %v680_v7 = vmul.f32 1.442695, %v471_v53  ;;  %v1460_v38 = vpop.eup %1459  ;;  %1469 = vpow2.f32 %v678_v0  ;;  %v2496_v0 = vld [vmem:[%s1916_s24 + $0x2f8] sm:$0xff] }
 0x24b   : > { %v836_v18 = vadd.f32 %v1436_v1, %v835_v11  ;;  %v474_v11 = vsub.f32 %v3224_v51, %v2287_v31  ;;  %v682_v1 = vmul.f32 1.442695, %v472_v14  ;;  %v1462_v40 = vpop.eup %1461  ;;  %1471 = vpow2.f32 %v680_v7  ;;  %v2501_v7 = vld [vmem:[%s1916_s24 + $0x300] sm:$0xff] }
 0x24d   : > { %v837_v43 = vadd.f32 %v1438_v47, %v836_v18  ;;  %v475_v18 = vsub.f32 %v3225_v15, %v2287_v31  ;;  %v684_v47 = vmul.f32 1.442695, %v473_v29  ;;  %v1464_v19 = vpop.eup %1463  ;;  %1473 = vpow2.f32 %v682_v1  ;;  %v2506_v1 = vld [vmem:[%s1916_s24 + $0x308] sm:$0xff] }
 0x24f   : > { %v838_v39 = vadd.f32 %v1440_v20, %v837_v43  ;;  %v476_v43 = vsub.f32 %v3226_v42, %v2287_v31  ;;  %v686_v20 = vmul.f32 1.442695, %v474_v11  ;;  %v1466_v23 = vpop.eup %1465  ;;  %1475 = vpow2.f32 %v684_v47  ;;  %v2511_v47 = vld [vmem:[%s1916_s24 + $0x310] sm:$0xff] }
 0x251   : > { %v839_v49 = vadd.f32 %v1442_v4, %v838_v39  ;;  %v477_v39 = vsub.f32 %v2456_v44, %v2287_v31  ;;  %v688_v4 = vmul.f32 1.442695, %v475_v18  ;;  %v1468_v27 = vpop.eup %1467  ;;  %1477 = vpow2.f32 %v686_v20  ;;  %v2516_v20 = vld [vmem:[%s1916_s24 + $0x318] sm:$0xff] }
 0x253   : > { %v840_v6 = vadd.f32 %v1444_v63, %v839_v49  ;;  %v478_v49 = vsub.f32 %v2461_v46, %v2287_v31  ;;  %v690_v63 = vmul.f32 1.442695, %v476_v43  ;;  %v1470_v48 = vpop.eup %1469  ;;  %1479 = vpow2.f32 %v688_v4 }
 0x255   : > { %v841_v5 = vadd.f32 %v1446_v25, %v840_v6  ;;  %v479_v6 = vsub.f32 %v2466_v24, %v2287_v31  ;;  %v692_v25 = vmul.f32 1.442695, %v477_v39  ;;  %v1472_v33 = vpop.eup %1471  ;;  %1481 = vpow2.f32 %v690_v63 }
 0x257   : > { %v842_v54 = vadd.f32 %v1448_v52, %v841_v5  ;;  %v480_v5 = vsub.f32 %v2471_v26, %v2287_v31  ;;  %v694_v52 = vmul.f32 1.442695, %v478_v49  ;;  %v1474_v61 = vpop.eup %1473  ;;  %1483 = vpow2.f32 %v692_v25 }
 0x259   : > { %v843_v30 = vadd.f32 %v1450_v37, %v842_v54  ;;  %v481_v54 = vsub.f32 %v2476_v28, %v2287_v31  ;;  %v696_v37 = vmul.f32 1.442695, %v479_v6  ;;  %v1476_v10 = vpop.eup %1475  ;;  %1485 = vpow2.f32 %v694_v52 }
 0x25b   : > { %v844_v32 = vadd.f32 %v1452_v55, %v843_v30  ;;  %v482_v30 = vsub.f32 %v2481_v56, %v2287_v31  ;;  %v698_v55 = vmul.f32 1.442695, %v480_v5  ;;  %v1478_v58 = vpop.eup %1477  ;;  %1487 = vpow2.f32 %v696_v37  ;;  %v2531_v5 = vld [vmem:[%s1916_s24 + $0x330] sm:$0xff]  ;;  %v2536_v37 = vld [vmem:[%s1916_s24 + $0x338] sm:$0xff] }
 0x25c   : > { %v492_v52 = vsub.f32 %v2531_v5, %v2287_v31 }
 0x25d   : > { %v845_v34 = vadd.f32 %v1454_v12, %v844_v32  ;;  %v483_v32 = vsub.f32 %v2486_v21, %v2287_v31  ;;  %v700_v12 = vmul.f32 1.442695, %v481_v54  ;;  %v1480_v53 = vpop.eup %1479  ;;  %1489 = vpow2.f32 %v698_v55 }
 0x25f   : > { %v846_v3 = vadd.f32 %v1456_v62, %v845_v34  ;;  %v484_v34 = vsub.f32 %v2491_v9, %v2287_v31  ;;  %v702_v62 = vmul.f32 1.442695, %v482_v30  ;;  %v1482_v14 = vpop.eup %1481  ;;  %1491 = vpow2.f32 %v700_v12 }
 0x261   : > { %v847_v16 = vadd.f32 %v1458_v36, %v846_v3  ;;  %v485_v3 = vsub.f32 %v2496_v0, %v2287_v31  ;;  %v704_v36 = vmul.f32 1.442695, %v483_v32  ;;  %v1484_v29 = vpop.eup %1483  ;;  %1493 = vpow2.f32 %v702_v62 }
 0x262   : > { %v722_v32 = vmul.f32 1.442695, %v492_v52 }
 0x263   : > { %v848_v45 = vadd.f32 %v1460_v38, %v847_v16  ;;  %v486_v16 = vsub.f32 %v2501_v7, %v2287_v31  ;;  %v706_v38 = vmul.f32 1.442695, %v484_v34  ;;  %v1486_v11 = vpop.eup %1485  ;;  %1495 = vpow2.f32 %v704_v36 }
 0x265   : > { %v849_v2 = vadd.f32 %v1462_v40, %v848_v45  ;;  %v487_v45 = vsub.f32 %v2506_v1, %v2287_v31  ;;  %v708_v40 = vmul.f32 1.442695, %v485_v3  ;;  %v1488_v18 = vpop.eup %1487  ;;  %1497 = vpow2.f32 %v706_v38  ;;  %v2551_v3 = vld [vmem:[%s1916_s24 + $0x350] sm:$0xff]  ;;  %v2556_v38 = vld [vmem:[%s1916_s24 + $0x358] sm:$0xff] }
 0x266   : > { %v496_v36 = vsub.f32 %v2551_v3, %v2287_v31 }
 0x267   : > { %v850_v35 = vadd.f32 %v1464_v19, %v849_v2  ;;  %v488_v2 = vsub.f32 %v2511_v47, %v2287_v31  ;;  %v710_v19 = vmul.f32 1.442695, %v486_v16  ;;  %v1490_v43 = vpop.eup %1489  ;;  %1499 = vpow2.f32 %v708_v40 }
 0x269   : > { %v851_v22 = vadd.f32 %v1466_v23, %v850_v35  ;;  %v489_v35 = vsub.f32 %v2516_v20, %v2287_v31  ;;  %v712_v23 = vmul.f32 1.442695, %v487_v45  ;;  %v1492_v4 = vpop.eup %1491  ;;  %1501 = vpow2.f32 %v710_v19 }
 0x26a   : > { %v714_v49 = vmul.f32 1.442695, %v488_v2  ;;  %v730_v2 = vmul.f32 1.442695, %v496_v36 }
 0x26b   : > { %v852_v59 = vadd.f32 %v1468_v27, %v851_v22  ;;  %v2521_v22 = vld [vmem:[%s1916_s24 + $0x320] sm:$0xff]  ;;  %1503 = vpow2.f32 %v712_v23  ;;  %v716_v25 = vmul.f32 1.442695, %v489_v35 }
 0x26c   : > { %v490_v27 = vsub.f32 %v2521_v22, %v2287_v31  ;;  %1505 = vpow2.f32 %v714_v49 }
 0x26d   : > { %v853_v50 = vadd.f32 %v1470_v48, %v852_v59  ;;  %v1494_v59 = vpop.eup %1493  ;;  %v2526_v48 = vld [vmem:[%s1916_s24 + $0x328] sm:$0xff]  ;;  %1507 = vpow2.f32 %v716_v25  ;;  %v2576_v25 = vld [vmem:[%s1916_s24 + $0x378] sm:$0xff] }
 0x26e   : > { %v491_v6 = vsub.f32 %v2526_v48, %v2287_v31 }
 0x26f   : > { %v854_v8 = vadd.f32 %v1472_v33, %v853_v50  ;;  %v1496_v33 = vpop.eup %1495 }
 0x270   : > { %v1498_v54 = vpop.eup %1497 }
 0x271   : > { %v855_v17 = vadd.f32 %v1474_v61, %v854_v8  ;;  %v718_v8 = vmul.f32 1.442695, %v490_v27  ;;  %v1500_v55 = vpop.eup %1499  ;;  %v2571_v27 = vld [vmem:[%s1916_s24 + $0x370] sm:$0xff] }
 0x272   : > { %v500_v49 = vsub.f32 %v2571_v27, %v2287_v31 }
 0x273   : > { %v856_v57 = vadd.f32 %v1476_v10, %v855_v17  ;;  %v493_v17 = vsub.f32 %v2536_v37, %v2287_v31  ;;  %v720_v10 = vmul.f32 1.442695, %v491_v6  ;;  %1509 = vpow2.f32 %v718_v8 }
 0x275   : > { %v857_v60 = vadd.f32 %v1478_v58, %v856_v57  ;;  %v2541_v57 = vld [vmem:[%s1916_s24 + $0x340] sm:$0xff]  ;;  %1511 = vpow2.f32 %v720_v10  ;;  %v724_v62 = vmul.f32 1.442695, %v493_v17  ;;  %v738_v17 = vmul.f32 1.442695, %v500_v49  ;;  %v2611_v49 = vld [vmem:[%s1916_s24 + $0x3b0] sm:$0xff] }
 0x276   : > { %v494_v58 = vsub.f32 %v2541_v57, %v2287_v31  ;;  %1513 = vpow2.f32 %v722_v32 }
 0x277   : > { %v858_v13 = vadd.f32 %v1480_v53, %v857_v60  ;;  %v1502_v60 = vpop.eup %1501  ;;  %v2546_v53 = vld [vmem:[%s1916_s24 + $0x348] sm:$0xff]  ;;  %1515 = vpow2.f32 %v724_v62 }
 0x278   : > { %v495_v34 = vsub.f32 %v2546_v53, %v2287_v31 }
 0x279   : > { %v859_v41 = vadd.f32 %v1482_v14, %v858_v13  ;;  %v1504_v14 = vpop.eup %1503 }
 0x27a   : > { %v1506_v16 = vpop.eup %1505 }
 0x27b   : > { %v860_v51 = vadd.f32 %v1484_v29, %v859_v41  ;;  %v726_v41 = vmul.f32 1.442695, %v494_v58  ;;  %v1508_v40 = vpop.eup %1507 }
 0x27d   : > { %v861_v15 = vadd.f32 %v1486_v11, %v860_v51  ;;  %v497_v51 = vsub.f32 %v2556_v38, %v2287_v31  ;;  %v728_v11 = vmul.f32 1.442695, %v495_v34  ;;  %1517 = vpow2.f32 %v726_v41  ;;  %v2591_v34 = vld [vmem:[%s1916_s24 + $0x390] sm:$0xff]  ;;  %v2596_v41 = vld [vmem:[%s1916_s24 + $0x398] sm:$0xff] }
 0x27e   : > { %v504_v62 = vsub.f32 %v2591_v34, %v2287_v31 }
 0x27f   : > { %v862_v42 = vadd.f32 %v1488_v18, %v861_v15  ;;  %v2561_v15 = vld [vmem:[%s1916_s24 + $0x360] sm:$0xff]  ;;  %1519 = vpow2.f32 %v728_v11  ;;  %v732_v23 = vmul.f32 1.442695, %v497_v51 }
 0x280   : > { %v498_v18 = vsub.f32 %v2561_v15, %v2287_v31  ;;  %1521 = vpow2.f32 %v730_v2 }
 0x281   : > { %v863_v39 = vadd.f32 %v1490_v43, %v862_v42  ;;  %v1510_v42 = vpop.eup %1509  ;;  %v2566_v43 = vld [vmem:[%s1916_s24 + $0x368] sm:$0xff]  ;;  %1523 = vpow2.f32 %v732_v23 }
 0x282   : > { %v499_v35 = vsub.f32 %v2566_v43, %v2287_v31 }
 0x283   : > { %v864_v63 = vadd.f32 %v1492_v4, %v863_v39  ;;  %v1512_v4 = vpop.eup %1511 }
 0x284   : > { %v1514_v6 = vpop.eup %1513 }
 0x285   : > { %v865_v50 = vadd.f32 %v1494_v59, %v864_v63  ;;  %v734_v63 = vmul.f32 1.442695, %v498_v18  ;;  %v1516_v8 = vpop.eup %1515  ;;  %v746_v18 = vmul.f32 1.442695, %v504_v62 }
 0x287   : > { %v866_v61 = vadd.f32 %v1496_v33, %v865_v50  ;;  %v501_v50 = vsub.f32 %v2576_v25, %v2287_v31  ;;  %v736_v33 = vmul.f32 1.442695, %v499_v35  ;;  %1525 = vpow2.f32 %v734_v63 }
 0x288   : > { %v508_v63 = vsub.f32 %v2611_v49, %v2287_v31 }
 0x289   : > { %v867_v30 = vadd.f32 %v1498_v54, %v866_v61  ;;  %v2581_v61 = vld [vmem:[%s1916_s24 + $0x380] sm:$0xff]  ;;  %1527 = vpow2.f32 %v736_v33  ;;  %v740_v32 = vmul.f32 1.442695, %v501_v50  ;;  %v2616_v33 = vld [vmem:[%s1916_s24 + $0x3b8] sm:$0xff] }
 0x28a   : > { %v502_v54 = vsub.f32 %v2581_v61, %v2287_v31  ;;  %1529 = vpow2.f32 %v738_v17 }
 0x28b   : > { %v868_v12 = vadd.f32 %v1500_v55, %v867_v30  ;;  %v1518_v30 = vpop.eup %1517  ;;  %v2586_v55 = vld [vmem:[%s1916_s24 + $0x388] sm:$0xff]  ;;  %1531 = vpow2.f32 %v740_v32 }
 0x28c   : > { %v503_v58 = vsub.f32 %v2586_v55, %v2287_v31 }
 0x28d   : > { %v869_v13 = vadd.f32 %v1502_v60, %v868_v12  ;;  %v1520_v60 = vpop.eup %1519 }
 0x28e   : > { %v1522_v36 = vpop.eup %1521 }
 0x28f   : > { %v870_v29 = vadd.f32 %v1504_v14, %v869_v13  ;;  %v742_v13 = vmul.f32 1.442695, %v502_v54  ;;  %v1524_v11 = vpop.eup %1523 }
 0x291   : > { %v871_v45 = vadd.f32 %v1506_v16, %v870_v29  ;;  %v505_v29 = vsub.f32 %v2596_v41, %v2287_v31  ;;  %v744_v16 = vmul.f32 1.442695, %v503_v58  ;;  %1533 = vpow2.f32 %v742_v13 }
 0x292   : > { %v754_v58 = vmul.f32 1.442695, %v508_v63 }
 0x293   : > { %v872_v19 = vadd.f32 %v1508_v40, %v871_v45  ;;  %v2601_v45 = vld [vmem:[%s1916_s24 + $0x3a0] sm:$0xff]  ;;  %1535 = vpow2.f32 %v744_v16  ;;  %v748_v23 = vmul.f32 1.442695, %v505_v29  ;;  %v2631_v29 = vld [vmem:[%s1916_s24 + $0x3d0] sm:$0xff] }
 0x294   : > { %v506_v40 = vsub.f32 %v2601_v45, %v2287_v31  ;;  %1537 = vpow2.f32 %v746_v18  ;;  %v512_v16 = vsub.f32 %v2631_v29, %v2287_v31  ;;  %v2636_v18 = vld [vmem:[%s1916_s24 + $0x3d8] sm:$0xff] }
 0x295   : > { %v873_v39 = vadd.f32 %v1510_v42, %v872_v19  ;;  %v1526_v19 = vpop.eup %1525  ;;  %v2606_v42 = vld [vmem:[%s1916_s24 + $0x3a8] sm:$0xff]  ;;  %1539 = vpow2.f32 %v748_v23 }
 0x296   : > { %v507_v35 = vsub.f32 %v2606_v42, %v2287_v31  ;;  %v762_v63 = vmul.f32 1.442695, %v512_v16 }
 0x297   : > { %v874_v59 = vadd.f32 %v1512_v4, %v873_v39  ;;  %v1528_v4 = vpop.eup %1527 }
 0x298   : > { %v1530_v50 = vpop.eup %1529 }
 0x299   : > { %v875_v52 = vadd.f32 %v1514_v6, %v874_v59  ;;  %v750_v59 = vmul.f32 1.442695, %v506_v40  ;;  %v1532_v17 = vpop.eup %1531 }
 0x29b   : > { %v876_v10 = vadd.f32 %v1516_v8, %v875_v52  ;;  %v509_v52 = vsub.f32 %v2616_v33, %v2287_v31  ;;  %v752_v8 = vmul.f32 1.442695, %v507_v35  ;;  %1541 = vpow2.f32 %v750_v59 }
 0x29d   : > { %v877_v12 = vadd.f32 %v1518_v30, %v876_v10  ;;  %v2621_v10 = vld [vmem:[%s1916_s24 + $0x3c0] sm:$0xff]  ;;  %1543 = vpow2.f32 %v752_v8  ;;  %v756_v13 = vmul.f32 1.442695, %v509_v52 }
 0x29e   : > { %v510_v30 = vsub.f32 %v2621_v10, %v2287_v31  ;;  %1545 = vpow2.f32 %v754_v58 }
 0x29f   : > { %v878_v14 = vadd.f32 %v1520_v60, %v877_v12  ;;  %v1534_v12 = vpop.eup %1533  ;;  %v2626_v60 = vld [vmem:[%s1916_s24 + $0x3c8] sm:$0xff]  ;;  %1547 = vpow2.f32 %v756_v13  ;;  %v2656_v13 = vld [vmem:[%s1916_s24 + $0x3f8] sm:$0xff] }
 0x2a0   : > { %v511_v62 = vsub.f32 %v2626_v60, %v2287_v31 }
 0x2a1   : > { %v879_v51 = vadd.f32 %v1522_v36, %v878_v14  ;;  %v1536_v36 = vpop.eup %1535 }
 0x2a2   : > { %v1538_v40 = vpop.eup %1537 }
 0x2a3   : > { %v880_v2 = vadd.f32 %v1524_v11, %v879_v51  ;;  %v758_v51 = vmul.f32 1.442695, %v510_v30  ;;  %v1540_v23 = vpop.eup %1539  ;;  %v2651_v30 = vld [vmem:[%s1916_s24 + $0x3f0] sm:$0xff] }
 0x2a4   : > { %v516_v58 = vsub.f32 %v2651_v30, %v2287_v31 }
 0x2a5   : > { %v881_v39 = vadd.f32 %v1526_v19, %v880_v2  ;;  %v513_v2 = vsub.f32 %v2636_v18, %v2287_v31  ;;  %v760_v19 = vmul.f32 1.442695, %v511_v62  ;;  %1549 = vpow2.f32 %v758_v51 }
 0x2a7   : > { %v882_v6 = vadd.f32 %v1528_v4, %v881_v39  ;;  %v2641_v39 = vld [vmem:[%s1916_s24 + $0x3e0] sm:$0xff]  ;;  %1551 = vpow2.f32 %v760_v19  ;;  %v764_v8 = vmul.f32 1.442695, %v513_v2 }
 0x2a8   : > { %v514_v4 = vsub.f32 %v2641_v39, %v2287_v31  ;;  %1553 = vpow2.f32 %v762_v63 }
 0x2a9   : > { %v883_v54 = vadd.f32 %v1530_v50, %v882_v6  ;;  %v1542_v6 = vpop.eup %1541  ;;  %v2646_v50 = vld [vmem:[%s1916_s24 + $0x3e8] sm:$0xff]  ;;  %1555 = vpow2.f32 %v764_v8 }
 0x2aa   : > { %v515_v52 = vsub.f32 %v2646_v50, %v2287_v31 }
 0x2ab   : > { %v884_v32 = vadd.f32 %v1532_v17, %v883_v54  ;;  %v1544_v17 = vpop.eup %1543 }
 0x2ac   : > { %v1546_v62 = vpop.eup %1545 }
 0x2ad   : > { %v885_v14 = vadd.f32 %v1534_v12, %v884_v32  ;;  %v766_v32 = vmul.f32 1.442695, %v514_v4  ;;  %v1548_v51 = vpop.eup %1547 }
 0x2af   : > { %v886_v11 = vadd.f32 %v1536_v36, %v885_v14  ;;  %v517_v14 = vsub.f32 %v2656_v13, %v2287_v31  ;;  %v768_v36 = vmul.f32 1.442695, %v515_v52  ;;  %1557 = vpow2.f32 %v766_v32  ;;  %v1550_v2 = vpop.eup %1549 }
 0x2b1   : > { %v887_v35 = vadd.f32 %v1538_v40, %v886_v11  ;;  %v770_v11 = vmul.f32 1.442695, %v516_v58  ;;  %1559 = vpow2.f32 %v768_v36  ;;  %v772_v19 = vmul.f32 1.442695, %v517_v14 }
 0x2b3   : > { %v888_v59 = vadd.f32 %v1540_v23, %v887_v35  ;;  %v1552_v23 = vpop.eup %1551  ;;  %1561 = vpow2.f32 %v770_v11 }
 0x2b4   : > { %v1554_v63 = vpop.eup %1553  ;;  %1563 = vpow2.f32 %v772_v19  ;;  %v1609_v19 = vld [vmem:[%s1916_s24 + $0x8] sm:$0xff] }
 0x2b5   : > { %v889_v54 = vadd.f32 %v1542_v6, %v888_v59  ;;  %v1556_v6 = vpop.eup %1555 }
 0x2b7   : > { %v890_v12 = vadd.f32 %v1544_v17, %v889_v54 }
 0x2b9   : > { %v891_v16 = vadd.f32 %v1546_v62, %v890_v12  ;;  %v1558_v8 = vpop.eup %1557 }
 0x2bb   : > { %v892_v40 = vadd.f32 %v1548_v51, %v891_v16  ;;  %v1560_v17 = vpop.eup %1559 }
 0x2bd   : > { %v893_v35 = vadd.f32 %v1550_v2, %v892_v40  ;;  %v1562_v32 = vpop.eup %1561  ;;  %v1608_v40 = vld [vmem:[%s1916_s24] sm:$0xff] }
 0x2be   : > { %v1564_v62 = vpop.eup %1563 }
 0x2bf   : > { %v894_v4 = vadd.f32 %v1552_v23, %v893_v35  ;;  %v1610_v23 = vld [vmem:[%s1916_s24 + $0x10] sm:$0xff] }
 0x2c1   : > { %v895_v59 = vadd.f32 %v1554_v63, %v894_v4  ;;  %v1611_v63 = vld [vmem:[%s1916_s24 + $0x18] sm:$0xff] }
 0x2c3   : > { %v896_v54 = vadd.f32 %v1556_v6, %v895_v59  ;;  %v1612_v6 = vld [vmem:[%s1916_s24 + $0x20] sm:$0xff] }
 0x2c5   : > { %v897_v52 = vadd.f32 %v1558_v8, %v896_v54  ;;  %v1613_v54 = vld [vmem:[%s1916_s24 + $0x28] sm:$0xff] }
 0x2c7   : > { %v898_v58 = vadd.f32 %v1560_v17, %v897_v52  ;;  %v1614_v52 = vld [vmem:[%s1916_s24 + $0x30] sm:$0xff] }
 0x2c9   : > { %v899_v12 = vadd.f32 %v1562_v32, %v898_v58  ;;  %v1615_v58 = vld [vmem:[%s1916_s24 + $0x38] sm:$0xff] }
 0x2cb   : > { %v900_v14 = vadd.f32 %v1564_v62, %v899_v12  ;;  %v1616_v12 = vld [vmem:[%s1916_s24 + $0x40] sm:$0xff] }
 0x2cd   : > { %901 = vadd.xlane.f32.xlu0 %v900_v14  ;;  %v1617_v14 = vld [vmem:[%s1916_s24 + $0x48] sm:$0xff] }
 0x35a   : > { %v902_v36 = vpop.xlane.xlu0 %901 }
 0x35b   : > { %1565 = vlog2.f32 %v902_v36 }
 0x365   : > { %v1566_v16 = vpop.eup %1565 }
 0x366   : > { %v904_v51 = vmul.f32 0.6931472, %v1566_v16  ;;  %v1618_v16 = vld [vmem:[%s1916_s24 + $0x50] sm:$0xff] }
 0x368   : > { %v2661_v11 = vadd.f32 %v904_v51, %v2287_v31 }
 0x36a   : > { %v906_v2 = vsub.f32 %v1608_v40, %v2661_v11  ;;  %v907_v35 = vsub.f32 %v1609_v19, %v2661_v11  ;;  %v908_v4 = vsub.f32 %v1610_v23, %v2661_v11  ;;  %v909_v59 = vsub.f32 %v1611_v63, %v2661_v11  ;;  %v1619_v40 = vld [vmem:[%s1916_s24 + $0x58] sm:$0xff]  ;;  %v1620_v23 = vld [vmem:[%s1916_s24 + $0x60] sm:$0xff] }
 0x36b   : > { %v910_v31 = vsub.f32 %v1612_v6, %v2661_v11  ;;  %v911_v8 = vsub.f32 %v1613_v54, %v2661_v11  ;;  %v912_v17 = vsub.f32 %v1614_v52, %v2661_v11  ;;  %v913_v32 = vsub.f32 %v1615_v58, %v2661_v11  ;;  %v1621_v6 = vld [vmem:[%s1916_s24 + $0x68] sm:$0xff]  ;;  %v1622_v52 = vld [vmem:[%s1916_s24 + $0x70] sm:$0xff] }
 0x36c   : > { %v914_v62 = vsub.f32 %v1616_v12, %v2661_v11  ;;  %v915_v36 = vsub.f32 %v1617_v14, %v2661_v11  ;;  %v916_v51 = vsub.f32 %v1618_v16, %v2661_v11  ;;  %v917_v19 = vsub.f32 %v1619_v40, %v2661_v11  ;;  %1034 = vst [vmem:[%s2689_s17] sm:$0xff] %v906_v2  ;;  %v1623_v12 = vld [vmem:[%s1916_s24 + $0x78] sm:$0xff]  ;;  %v1626_v16 = vld [vmem:[%s1916_s24 + $0x90] sm:$0xff] }
 0x36d   : > { %1035 = vst [vmem:[%s2689_s17 + $0x8] sm:$0xff] %v907_v35  ;;  %1036 = vst [vmem:[%s2689_s17 + $0x10] sm:$0xff] %v908_v4  ;;  %v918_v63 = vsub.f32 %v1620_v23, %v2661_v11  ;;  %v919_v54 = vsub.f32 %v1621_v6, %v2661_v11  ;;  %v920_v58 = vsub.f32 %v1622_v52, %v2661_v11  ;;  %v1624_v35 = vld [vmem:[%s1916_s24 + $0x80] sm:$0xff]  ;;  %v1627_v23 = vld [vmem:[%s1916_s24 + $0x98] sm:$0xff] }
 0x36e   : > { %1037 = vst [vmem:[%s2689_s17 + $0x18] sm:$0xff] %v909_v59  ;;  %v921_v2 = vsub.f32 %v1623_v12, %v2661_v11  ;;  %1038 = vst [vmem:[%s2689_s17 + $0x20] sm:$0xff] %v910_v31  ;;  %v922_v4 = vsub.f32 %v1624_v35, %v2661_v11  ;;  %v1625_v59 = vld [vmem:[%s1916_s24 + $0x88] sm:$0xff]  ;;  %v924_v40 = vsub.f32 %v1626_v16, %v2661_v11  ;;  %v1630_v52 = vld [vmem:[%s1916_s24 + $0xb0] sm:$0xff] }
 0x36f   : > { %1039 = vst [vmem:[%s2689_s17 + $0x28] sm:$0xff] %v911_v8  ;;  %1040 = vst [vmem:[%s2689_s17 + $0x30] sm:$0xff] %v912_v17  ;;  %v923_v14 = vsub.f32 %v1625_v59, %v2661_v11  ;;  %v925_v31 = vsub.f32 %v1627_v23, %v2661_v11  ;;  %v1628_v8 = vld [vmem:[%s1916_s24 + $0xa0] sm:$0xff]  ;;  %v928_v12 = vsub.f32 %v1630_v52, %v2661_v11  ;;  %v1631_v35 = vld [vmem:[%s1916_s24 + $0xb8] sm:$0xff] }
 0x370   : > { %1041 = vst [vmem:[%s2689_s17 + $0x38] sm:$0xff] %v913_v32  ;;  %1042 = vst [vmem:[%s2689_s17 + $0x40] sm:$0xff] %v914_v62  ;;  %v926_v17 = vsub.f32 %v1628_v8, %v2661_v11  ;;  %v1629_v32 = vld [vmem:[%s1916_s24 + $0xa8] sm:$0xff]  ;;  %v929_v62 = vsub.f32 %v1631_v35, %v2661_v11  ;;  %v1634_v16 = vld [vmem:[%s1916_s24 + $0xd0] sm:$0xff] }
 0x371   : > { %1043 = vst [vmem:[%s2689_s17 + $0x48] sm:$0xff] %v915_v36  ;;  %1044 = vst [vmem:[%s2689_s17 + $0x50] sm:$0xff] %v916_v51  ;;  %v927_v6 = vsub.f32 %v1629_v32, %v2661_v11  ;;  %v1632_v36 = vld [vmem:[%s1916_s24 + $0xc0] sm:$0xff]  ;;  %v932_v23 = vsub.f32 %v1634_v16, %v2661_v11  ;;  %v1635_v8 = vld [vmem:[%s1916_s24 + $0xd8] sm:$0xff] }
 0x372   : > { %1045 = vst [vmem:[%s2689_s17 + $0x58] sm:$0xff] %v917_v19  ;;  %1046 = vst [vmem:[%s2689_s17 + $0x60] sm:$0xff] %v918_v63  ;;  %v930_v51 = vsub.f32 %v1632_v36, %v2661_v11  ;;  %v1633_v19 = vld [vmem:[%s1916_s24 + $0xc8] sm:$0xff]  ;;  %v933_v63 = vsub.f32 %v1635_v8, %v2661_v11  ;;  %v1638_v52 = vld [vmem:[%s1916_s24 + $0xf0] sm:$0xff] }
 0x373   : > { %1047 = vst [vmem:[%s2689_s17 + $0x68] sm:$0xff] %v919_v54  ;;  %1048 = vst [vmem:[%s2689_s17 + $0x70] sm:$0xff] %v920_v58  ;;  %v931_v59 = vsub.f32 %v1633_v19, %v2661_v11  ;;  %v1636_v54 = vld [vmem:[%s1916_s24 + $0xe0] sm:$0xff]  ;;  %v936_v35 = vsub.f32 %v1638_v52, %v2661_v11  ;;  %v1639_v36 = vld [vmem:[%s1916_s24 + $0xf8] sm:$0xff] }
 0x374   : > { %1049 = vst [vmem:[%s2689_s17 + $0x78] sm:$0xff] %v921_v2  ;;  %1050 = vst [vmem:[%s2689_s17 + $0x80] sm:$0xff] %v922_v4  ;;  %v934_v58 = vsub.f32 %v1636_v54, %v2661_v11  ;;  %v1637_v2 = vld [vmem:[%s1916_s24 + $0xe8] sm:$0xff]  ;;  %v937_v4 = vsub.f32 %v1639_v36, %v2661_v11  ;;  %v1642_v16 = vld [vmem:[%s1916_s24 + $0x110] sm:$0xff] }
 0x375   : > { %1051 = vst [vmem:[%s2689_s17 + $0x88] sm:$0xff] %v923_v14  ;;  %1052 = vst [vmem:[%s2689_s17 + $0x90] sm:$0xff] %v924_v40  ;;  %v935_v32 = vsub.f32 %v1637_v2, %v2661_v11  ;;  %v1640_v14 = vld [vmem:[%s1916_s24 + $0x100] sm:$0xff]  ;;  %v940_v8 = vsub.f32 %v1642_v16, %v2661_v11  ;;  %v1643_v54 = vld [vmem:[%s1916_s24 + $0x118] sm:$0xff] }
 0x376   : > { %1053 = vst [vmem:[%s2689_s17 + $0x98] sm:$0xff] %v925_v31  ;;  %1054 = vst [vmem:[%s2689_s17 + $0xa0] sm:$0xff] %v926_v17  ;;  %v938_v40 = vsub.f32 %v1640_v14, %v2661_v11  ;;  %v1641_v31 = vld [vmem:[%s1916_s24 + $0x108] sm:$0xff]  ;;  %v941_v17 = vsub.f32 %v1643_v54, %v2661_v11  ;;  %v1646_v52 = vld [vmem:[%s1916_s24 + $0x130] sm:$0xff] }
 0x377   : > { %1055 = vst [vmem:[%s2689_s17 + $0xa8] sm:$0xff] %v927_v6  ;;  %1056 = vst [vmem:[%s2689_s17 + $0xb0] sm:$0xff] %v928_v12  ;;  %v939_v19 = vsub.f32 %v1641_v31, %v2661_v11  ;;  %v1644_v6 = vld [vmem:[%s1916_s24 + $0x120] sm:$0xff]  ;;  %v944_v36 = vsub.f32 %v1646_v52, %v2661_v11  ;;  %v1647_v14 = vld [vmem:[%s1916_s24 + $0x138] sm:$0xff] }
 0x378   : > { %1057 = vst [vmem:[%s2689_s17 + $0xb8] sm:$0xff] %v929_v62  ;;  %1058 = vst [vmem:[%s2689_s17 + $0xc0] sm:$0xff] %v930_v51  ;;  %v942_v12 = vsub.f32 %v1644_v6, %v2661_v11  ;;  %v1645_v62 = vld [vmem:[%s1916_s24 + $0x128] sm:$0xff]  ;;  %v945_v51 = vsub.f32 %v1647_v14, %v2661_v11  ;;  %v1650_v16 = vld [vmem:[%s1916_s24 + $0x150] sm:$0xff] }
 0x379   : > { %1059 = vst [vmem:[%s2689_s17 + $0xc8] sm:$0xff] %v931_v59  ;;  %1060 = vst [vmem:[%s2689_s17 + $0xd0] sm:$0xff] %v932_v23  ;;  %v943_v2 = vsub.f32 %v1645_v62, %v2661_v11  ;;  %v1648_v59 = vld [vmem:[%s1916_s24 + $0x140] sm:$0xff]  ;;  %v948_v54 = vsub.f32 %v1650_v16, %v2661_v11  ;;  %v1651_v6 = vld [vmem:[%s1916_s24 + $0x158] sm:$0xff] }
 0x37a   : > { %1061 = vst [vmem:[%s2689_s17 + $0xd8] sm:$0xff] %v933_v63  ;;  %1062 = vst [vmem:[%s2689_s17 + $0xe0] sm:$0xff] %v934_v58  ;;  %v946_v23 = vsub.f32 %v1648_v59, %v2661_v11  ;;  %v1649_v63 = vld [vmem:[%s1916_s24 + $0x148] sm:$0xff]  ;;  %v949_v58 = vsub.f32 %v1651_v6, %v2661_v11  ;;  %v1654_v52 = vld [vmem:[%s1916_s24 + $0x170] sm:$0xff] }
 0x37b   : > { %1063 = vst [vmem:[%s2689_s17 + $0xe8] sm:$0xff] %v935_v32  ;;  %1064 = vst [vmem:[%s2689_s17 + $0xf0] sm:$0xff] %v936_v35  ;;  %v947_v31 = vsub.f32 %v1649_v63, %v2661_v11  ;;  %v1652_v32 = vld [vmem:[%s1916_s24 + $0x160] sm:$0xff]  ;;  %v952_v14 = vsub.f32 %v1654_v52, %v2661_v11  ;;  %v1655_v59 = vld [vmem:[%s1916_s24 + $0x178] sm:$0xff] }
 0x37c   : > { %1065 = vst [vmem:[%s2689_s17 + $0xf8] sm:$0xff] %v937_v4  ;;  %1066 = vst [vmem:[%s2689_s17 + $0x100] sm:$0xff] %v938_v40  ;;  %v950_v35 = vsub.f32 %v1652_v32, %v2661_v11  ;;  %v1653_v4 = vld [vmem:[%s1916_s24 + $0x168] sm:$0xff]  ;;  %v953_v40 = vsub.f32 %v1655_v59, %v2661_v11  ;;  %v1658_v16 = vld [vmem:[%s1916_s24 + $0x190] sm:$0xff] }
 0x37d   : > { %1067 = vst [vmem:[%s2689_s17 + $0x108] sm:$0xff] %v939_v19  ;;  %1068 = vst [vmem:[%s2689_s17 + $0x110] sm:$0xff] %v940_v8  ;;  %v951_v62 = vsub.f32 %v1653_v4, %v2661_v11  ;;  %v1656_v19 = vld [vmem:[%s1916_s24 + $0x180] sm:$0xff]  ;;  %v956_v6 = vsub.f32 %v1658_v16, %v2661_v11  ;;  %v1659_v32 = vld [vmem:[%s1916_s24 + $0x198] sm:$0xff] }
 0x37e   : > { %1069 = vst [vmem:[%s2689_s17 + $0x118] sm:$0xff] %v941_v17  ;;  %1070 = vst [vmem:[%s2689_s17 + $0x120] sm:$0xff] %v942_v12  ;;  %v954_v8 = vsub.f32 %v1656_v19, %v2661_v11  ;;  %v1657_v17 = vld [vmem:[%s1916_s24 + $0x188] sm:$0xff]  ;;  %v957_v12 = vsub.f32 %v1659_v32, %v2661_v11  ;;  %v1662_v52 = vld [vmem:[%s1916_s24 + $0x1b0] sm:$0xff] }
 0x37f   : > { %1071 = vst [vmem:[%s2689_s17 + $0x128] sm:$0xff] %v943_v2  ;;  %1072 = vst [vmem:[%s2689_s17 + $0x130] sm:$0xff] %v944_v36  ;;  %v955_v63 = vsub.f32 %v1657_v17, %v2661_v11  ;;  %v1660_v2 = vld [vmem:[%s1916_s24 + $0x1a0] sm:$0xff]  ;;  %v960_v59 = vsub.f32 %v1662_v52, %v2661_v11  ;;  %v1663_v19 = vld [vmem:[%s1916_s24 + $0x1b8] sm:$0xff] }
 0x380   : > { %1073 = vst [vmem:[%s2689_s17 + $0x138] sm:$0xff] %v945_v51  ;;  %1074 = vst [vmem:[%s2689_s17 + $0x140] sm:$0xff] %v946_v23  ;;  %v958_v36 = vsub.f32 %v1660_v2, %v2661_v11  ;;  %v1661_v51 = vld [vmem:[%s1916_s24 + $0x1a8] sm:$0xff]  ;;  %v961_v23 = vsub.f32 %v1663_v19, %v2661_v11  ;;  %v1666_v16 = vld [vmem:[%s1916_s24 + $0x1d0] sm:$0xff] }
 0x381   : > { %1075 = vst [vmem:[%s2689_s17 + $0x148] sm:$0xff] %v947_v31  ;;  %1076 = vst [vmem:[%s2689_s17 + $0x150] sm:$0xff] %v948_v54  ;;  %v959_v4 = vsub.f32 %v1661_v51, %v2661_v11  ;;  %v1664_v31 = vld [vmem:[%s1916_s24 + $0x1c0] sm:$0xff]  ;;  %v964_v32 = vsub.f32 %v1666_v16, %v2661_v11  ;;  %v1667_v2 = vld [vmem:[%s1916_s24 + $0x1d8] sm:$0xff] }
 0x382   : > { %1077 = vst [vmem:[%s2689_s17 + $0x158] sm:$0xff] %v949_v58  ;;  %1078 = vst [vmem:[%s2689_s17 + $0x160] sm:$0xff] %v950_v35  ;;  %v962_v54 = vsub.f32 %v1664_v31, %v2661_v11  ;;  %v1665_v58 = vld [vmem:[%s1916_s24 + $0x1c8] sm:$0xff]  ;;  %v965_v35 = vsub.f32 %v1667_v2, %v2661_v11  ;;  %v1670_v52 = vld [vmem:[%s1916_s24 + $0x1f0] sm:$0xff] }
 0x383   : > { %1079 = vst [vmem:[%s2689_s17 + $0x168] sm:$0xff] %v951_v62  ;;  %1080 = vst [vmem:[%s2689_s17 + $0x170] sm:$0xff] %v952_v14  ;;  %v963_v17 = vsub.f32 %v1665_v58, %v2661_v11  ;;  %v1668_v62 = vld [vmem:[%s1916_s24 + $0x1e0] sm:$0xff]  ;;  %v968_v19 = vsub.f32 %v1670_v52, %v2661_v11  ;;  %v1671_v31 = vld [vmem:[%s1916_s24 + $0x1f8] sm:$0xff] }
 0x384   : > { %1081 = vst [vmem:[%s2689_s17 + $0x178] sm:$0xff] %v953_v40  ;;  %1082 = vst [vmem:[%s2689_s17 + $0x180] sm:$0xff] %v954_v8  ;;  %v966_v14 = vsub.f32 %v1668_v62, %v2661_v11  ;;  %v1669_v40 = vld [vmem:[%s1916_s24 + $0x1e8] sm:$0xff]  ;;  %v969_v8 = vsub.f32 %v1671_v31, %v2661_v11  ;;  %v1674_v16 = vld [vmem:[%s1916_s24 + $0x210] sm:$0xff] }
 0x385   : > { %1083 = vst [vmem:[%s2689_s17 + $0x188] sm:$0xff] %v955_v63  ;;  %1084 = vst [vmem:[%s2689_s17 + $0x190] sm:$0xff] %v956_v6  ;;  %v967_v51 = vsub.f32 %v1669_v40, %v2661_v11  ;;  %v1672_v63 = vld [vmem:[%s1916_s24 + $0x200] sm:$0xff]  ;;  %v972_v2 = vsub.f32 %v1674_v16, %v2661_v11  ;;  %v1675_v62 = vld [vmem:[%s1916_s24 + $0x218] sm:$0xff] }
 0x386   : > { %1085 = vst [vmem:[%s2689_s17 + $0x198] sm:$0xff] %v957_v12  ;;  %1086 = vst [vmem:[%s2689_s17 + $0x1a0] sm:$0xff] %v958_v36  ;;  %v970_v6 = vsub.f32 %v1672_v63, %v2661_v11  ;;  %v1673_v12 = vld [vmem:[%s1916_s24 + $0x208] sm:$0xff]  ;;  %v973_v36 = vsub.f32 %v1675_v62, %v2661_v11  ;;  %v1678_v52 = vld [vmem:[%s1916_s24 + $0x230] sm:$0xff] }
 0x387   : > { %1087 = vst [vmem:[%s2689_s17 + $0x1a8] sm:$0xff] %v959_v4  ;;  %1088 = vst [vmem:[%s2689_s17 + $0x1b0] sm:$0xff] %v960_v59  ;;  %v971_v58 = vsub.f32 %v1673_v12, %v2661_v11  ;;  %v1676_v4 = vld [vmem:[%s1916_s24 + $0x220] sm:$0xff]  ;;  %v976_v31 = vsub.f32 %v1678_v52, %v2661_v11  ;;  %v1679_v63 = vld [vmem:[%s1916_s24 + $0x238] sm:$0xff] }
 0x388   : > { %1089 = vst [vmem:[%s2689_s17 + $0x1b8] sm:$0xff] %v961_v23  ;;  %1090 = vst [vmem:[%s2689_s17 + $0x1c0] sm:$0xff] %v962_v54  ;;  %v974_v59 = vsub.f32 %v1676_v4, %v2661_v11  ;;  %v1677_v23 = vld [vmem:[%s1916_s24 + $0x228] sm:$0xff]  ;;  %v977_v54 = vsub.f32 %v1679_v63, %v2661_v11  ;;  %v1682_v16 = vld [vmem:[%s1916_s24 + $0x250] sm:$0xff] }
 0x389   : > { %1091 = vst [vmem:[%s2689_s17 + $0x1c8] sm:$0xff] %v963_v17  ;;  %1092 = vst [vmem:[%s2689_s17 + $0x1d0] sm:$0xff] %v964_v32  ;;  %v975_v40 = vsub.f32 %v1677_v23, %v2661_v11  ;;  %v1680_v17 = vld [vmem:[%s1916_s24 + $0x240] sm:$0xff]  ;;  %v980_v62 = vsub.f32 %v1682_v16, %v2661_v11  ;;  %v1683_v4 = vld [vmem:[%s1916_s24 + $0x258] sm:$0xff] }
 0x38a   : > { %1093 = vst [vmem:[%s2689_s17 + $0x1d8] sm:$0xff] %v965_v35  ;;  %1094 = vst [vmem:[%s2689_s17 + $0x1e0] sm:$0xff] %v966_v14  ;;  %v978_v32 = vsub.f32 %v1680_v17, %v2661_v11  ;;  %v1681_v35 = vld [vmem:[%s1916_s24 + $0x248] sm:$0xff]  ;;  %v981_v14 = vsub.f32 %v1683_v4, %v2661_v11  ;;  %v1686_v52 = vld [vmem:[%s1916_s24 + $0x270] sm:$0xff] }
 0x38b   : > { %1095 = vst [vmem:[%s2689_s17 + $0x1e8] sm:$0xff] %v967_v51  ;;  %1096 = vst [vmem:[%s2689_s17 + $0x1f0] sm:$0xff] %v968_v19  ;;  %v979_v12 = vsub.f32 %v1681_v35, %v2661_v11  ;;  %v1684_v51 = vld [vmem:[%s1916_s24 + $0x260] sm:$0xff]  ;;  %v984_v63 = vsub.f32 %v1686_v52, %v2661_v11  ;;  %v1687_v17 = vld [vmem:[%s1916_s24 + $0x278] sm:$0xff] }
 0x38c   : > { %1097 = vst [vmem:[%s2689_s17 + $0x1f8] sm:$0xff] %v969_v8  ;;  %1098 = vst [vmem:[%s2689_s17 + $0x200] sm:$0xff] %v970_v6  ;;  %v982_v19 = vsub.f32 %v1684_v51, %v2661_v11  ;;  %v1685_v8 = vld [vmem:[%s1916_s24 + $0x268] sm:$0xff]  ;;  %v985_v6 = vsub.f32 %v1687_v17, %v2661_v11  ;;  %v1690_v16 = vld [vmem:[%s1916_s24 + $0x290] sm:$0xff] }
 0x38d   : > { %1099 = vst [vmem:[%s2689_s17 + $0x208] sm:$0xff] %v971_v58  ;;  %1100 = vst [vmem:[%s2689_s17 + $0x210] sm:$0xff] %v972_v2  ;;  %v983_v23 = vsub.f32 %v1685_v8, %v2661_v11  ;;  %v1688_v58 = vld [vmem:[%s1916_s24 + $0x280] sm:$0xff]  ;;  %v988_v4 = vsub.f32 %v1690_v16, %v2661_v11  ;;  %v1691_v51 = vld [vmem:[%s1916_s24 + $0x298] sm:$0xff] }
 0x38e   : > { %1101 = vst [vmem:[%s2689_s17 + $0x218] sm:$0xff] %v973_v36  ;;  %1102 = vst [vmem:[%s2689_s17 + $0x220] sm:$0xff] %v974_v59  ;;  %v986_v2 = vsub.f32 %v1688_v58, %v2661_v11  ;;  %v1689_v36 = vld [vmem:[%s1916_s24 + $0x288] sm:$0xff]  ;;  %v989_v59 = vsub.f32 %v1691_v51, %v2661_v11  ;;  %v1694_v52 = vld [vmem:[%s1916_s24 + $0x2b0] sm:$0xff]  ;;  %v993_v58 = vsub.f32 %v2456_v44, %v2661_v11 }
 0x38f   : > { %1103 = vst [vmem:[%s2689_s17 + $0x228] sm:$0xff] %v975_v40  ;;  %1104 = vst [vmem:[%s2689_s17 + $0x230] sm:$0xff] %v976_v31  ;;  %v987_v35 = vsub.f32 %v1689_v36, %v2661_v11  ;;  %v1692_v40 = vld [vmem:[%s1916_s24 + $0x2a0] sm:$0xff]  ;;  %v992_v17 = vsub.f32 %v1694_v52, %v2661_v11  ;;  %v997_v44 = vsub.f32 %v2476_v28, %v2661_v11 }
 0x390   : > { %1105 = vst [vmem:[%s2689_s17 + $0x238] sm:$0xff] %v977_v54  ;;  %1106 = vst [vmem:[%s2689_s17 + $0x240] sm:$0xff] %v978_v32  ;;  %v990_v31 = vsub.f32 %v1692_v40, %v2661_v11  ;;  %v1693_v54 = vld [vmem:[%s1916_s24 + $0x2a8] sm:$0xff]  ;;  %v994_v32 = vsub.f32 %v2461_v46, %v2661_v11  ;;  %v998_v46 = vsub.f32 %v2481_v56, %v2661_v11 }
 0x391   : > { %1107 = vst [vmem:[%s2689_s17 + $0x248] sm:$0xff] %v979_v12  ;;  %1108 = vst [vmem:[%s2689_s17 + $0x250] sm:$0xff] %v980_v62  ;;  %v991_v8 = vsub.f32 %v1693_v54, %v2661_v11  ;;  %v995_v12 = vsub.f32 %v2466_v24, %v2661_v11  ;;  %v996_v62 = vsub.f32 %v2471_v26, %v2661_v11 }
 0x392   : > { %1109 = vst [vmem:[%s2689_s17 + $0x258] sm:$0xff] %v981_v14  ;;  %1110 = vst [vmem:[%s2689_s17 + $0x260] sm:$0xff] %v982_v19  ;;  %v999_v24 = vsub.f32 %v2486_v21, %v2661_v11  ;;  %v1000_v26 = vsub.f32 %v2491_v9, %v2661_v11  ;;  %v1001_v28 = vsub.f32 %v2496_v0, %v2661_v11 }
 0x393   : > { %1111 = vst [vmem:[%s2689_s17 + $0x268] sm:$0xff] %v983_v23  ;;  %1112 = vst [vmem:[%s2689_s17 + $0x270] sm:$0xff] %v984_v63  ;;  %v1002_v56 = vsub.f32 %v2501_v7, %v2661_v11  ;;  %v1003_v21 = vsub.f32 %v2506_v1, %v2661_v11  ;;  %v1004_v9 = vsub.f32 %v2511_v47, %v2661_v11 }
 0x394   : > { %1113 = vst [vmem:[%s2689_s17 + $0x278] sm:$0xff] %v985_v6  ;;  %1114 = vst [vmem:[%s2689_s17 + $0x280] sm:$0xff] %v986_v2  ;;  %v1005_v0 = vsub.f32 %v2516_v20, %v2661_v11  ;;  %v1006_v7 = vsub.f32 %v2521_v22, %v2661_v11  ;;  %v1007_v1 = vsub.f32 %v2526_v48, %v2661_v11 }
 0x395   : > { %1115 = vst [vmem:[%s2689_s17 + $0x288] sm:$0xff] %v987_v35  ;;  %1116 = vst [vmem:[%s2689_s17 + $0x290] sm:$0xff] %v988_v4  ;;  %v1008_v47 = vsub.f32 %v2531_v5, %v2661_v11  ;;  %v1009_v20 = vsub.f32 %v2536_v37, %v2661_v11  ;;  %v1010_v22 = vsub.f32 %v2541_v57, %v2661_v11 }
 0x396   : > { %1117 = vst [vmem:[%s2689_s17 + $0x298] sm:$0xff] %v989_v59  ;;  %1118 = vst [vmem:[%s2689_s17 + $0x2a0] sm:$0xff] %v990_v31  ;;  %v1011_v48 = vsub.f32 %v2546_v53, %v2661_v11  ;;  %v1012_v5 = vsub.f32 %v2551_v3, %v2661_v11  ;;  %v1013_v37 = vsub.f32 %v2556_v38, %v2661_v11 }
 0x397   : > { %1119 = vst [vmem:[%s2689_s17 + $0x2a8] sm:$0xff] %v991_v8  ;;  %1120 = vst [vmem:[%s2689_s17 + $0x2b0] sm:$0xff] %v992_v17  ;;  %v1014_v57 = vsub.f32 %v2561_v15, %v2661_v11  ;;  %v1015_v53 = vsub.f32 %v2566_v43, %v2661_v11  ;;  %v1016_v3 = vsub.f32 %v2571_v27, %v2661_v11 }
 0x398   : > { %1121 = vst [vmem:[%s2689_s17 + $0x2b8] sm:$0xff] %v993_v58  ;;  %1122 = vst [vmem:[%s2689_s17 + $0x2c0] sm:$0xff] %v994_v32  ;;  %v1017_v38 = vsub.f32 %v2576_v25, %v2661_v11  ;;  %v1018_v15 = vsub.f32 %v2581_v61, %v2661_v11  ;;  %v1019_v43 = vsub.f32 %v2586_v55, %v2661_v11 }
 0x399   : > { %1123 = vst [vmem:[%s2689_s17 + $0x2c8] sm:$0xff] %v995_v12  ;;  %1124 = vst [vmem:[%s2689_s17 + $0x2d0] sm:$0xff] %v996_v62  ;;  %v1020_v27 = vsub.f32 %v2591_v34, %v2661_v11  ;;  %v1021_v25 = vsub.f32 %v2596_v41, %v2661_v11  ;;  %v1022_v61 = vsub.f32 %v2601_v45, %v2661_v11 }
 0x39a   : > { %1125 = vst [vmem:[%s2689_s17 + $0x2d8] sm:$0xff] %v997_v44  ;;  %1126 = vst [vmem:[%s2689_s17 + $0x2e0] sm:$0xff] %v998_v46  ;;  %v1023_v55 = vsub.f32 %v2606_v42, %v2661_v11  ;;  %v1024_v34 = vsub.f32 %v2611_v49, %v2661_v11  ;;  %v1025_v41 = vsub.f32 %v2616_v33, %v2661_v11 }
 0x39b   : > { %1127 = vst [vmem:[%s2689_s17 + $0x2e8] sm:$0xff] %v999_v24  ;;  %1128 = vst [vmem:[%s2689_s17 + $0x2f0] sm:$0xff] %v1000_v26  ;;  %v1026_v45 = vsub.f32 %v2621_v10, %v2661_v11  ;;  %v1027_v42 = vsub.f32 %v2626_v60, %v2661_v11  ;;  %v1028_v49 = vsub.f32 %v2631_v29, %v2661_v11 }
 0x39c   : > { %1129 = vst [vmem:[%s2689_s17 + $0x2f8] sm:$0xff] %v1001_v28  ;;  %1130 = vst [vmem:[%s2689_s17 + $0x300] sm:$0xff] %v1002_v56  ;;  %v1029_v33 = vsub.f32 %v2636_v18, %v2661_v11  ;;  %v1030_v10 = vsub.f32 %v2641_v39, %v2661_v11  ;;  %v1031_v60 = vsub.f32 %v2646_v50, %v2661_v11 }
 0x39d   : > { %1131 = vst [vmem:[%s2689_s17 + $0x308] sm:$0xff] %v1003_v21  ;;  %1132 = vst [vmem:[%s2689_s17 + $0x310] sm:$0xff] %v1004_v9  ;;  %v1032_v29 = vsub.f32 %v2651_v30, %v2661_v11  ;;  %v1033_v18 = vsub.f32 %v2656_v13, %v2661_v11 }
 0x39e   : > { %1133 = vst [vmem:[%s2689_s17 + $0x318] sm:$0xff] %v1005_v0  ;;  %1134 = vst [vmem:[%s2689_s17 + $0x320] sm:$0xff] %v1006_v7 }
 0x39f   : > { %1135 = vst [vmem:[%s2689_s17 + $0x328] sm:$0xff] %v1007_v1  ;;  %1136 = vst [vmem:[%s2689_s17 + $0x330] sm:$0xff] %v1008_v47 }
 0x3a0   : > { %1137 = vst [vmem:[%s2689_s17 + $0x338] sm:$0xff] %v1009_v20  ;;  %1138 = vst [vmem:[%s2689_s17 + $0x340] sm:$0xff] %v1010_v22 }
 0x3a1   : > { %1139 = vst [vmem:[%s2689_s17 + $0x348] sm:$0xff] %v1011_v48  ;;  %1140 = vst [vmem:[%s2689_s17 + $0x350] sm:$0xff] %v1012_v5 }
 0x3a2   : > { %1141 = vst [vmem:[%s2689_s17 + $0x358] sm:$0xff] %v1013_v37  ;;  %1142 = vst [vmem:[%s2689_s17 + $0x360] sm:$0xff] %v1014_v57 }
 0x3a3   : > { %1143 = vst [vmem:[%s2689_s17 + $0x368] sm:$0xff] %v1015_v53  ;;  %1144 = vst [vmem:[%s2689_s17 + $0x370] sm:$0xff] %v1016_v3 }
 0x3a4   : > { %1145 = vst [vmem:[%s2689_s17 + $0x378] sm:$0xff] %v1017_v38  ;;  %1146 = vst [vmem:[%s2689_s17 + $0x380] sm:$0xff] %v1018_v15 }
 0x3a5   : > { %1147 = vst [vmem:[%s2689_s17 + $0x388] sm:$0xff] %v1019_v43  ;;  %1148 = vst [vmem:[%s2689_s17 + $0x390] sm:$0xff] %v1020_v27 }
 0x3a6   : > { %1149 = vst [vmem:[%s2689_s17 + $0x398] sm:$0xff] %v1021_v25  ;;  %1150 = vst [vmem:[%s2689_s17 + $0x3a0] sm:$0xff] %v1022_v61 }
 0x3a7   : > { %1151 = vst [vmem:[%s2689_s17 + $0x3a8] sm:$0xff] %v1023_v55  ;;  %1152 = vst [vmem:[%s2689_s17 + $0x3b0] sm:$0xff] %v1024_v34 }
 0x3a8   : > { %1153 = vst [vmem:[%s2689_s17 + $0x3b8] sm:$0xff] %v1025_v41  ;;  %1154 = vst [vmem:[%s2689_s17 + $0x3c0] sm:$0xff] %v1026_v45 }
 0x3a9   : > { %1155 = vst [vmem:[%s2689_s17 + $0x3c8] sm:$0xff] %v1027_v42  ;;  %1156 = vst [vmem:[%s2689_s17 + $0x3d0] sm:$0xff] %v1028_v49 }
 0x3aa   : > { %1157 = vst [vmem:[%s2689_s17 + $0x3d8] sm:$0xff] %v1029_v33  ;;  %1158 = vst [vmem:[%s2689_s17 + $0x3e0] sm:$0xff] %v1030_v10 }
 0x3ab   : > { %1159 = vst [vmem:[%s2689_s17 + $0x3e8] sm:$0xff] %v1031_v60  ;;  %1160 = vst [vmem:[%s2689_s17 + $0x3f0] sm:$0xff] %v1032_v29 }
 0x3ac   : > { %1161 = vst [vmem:[%s2689_s17 + $0x3f8] sm:$0xff] %v1033_v18 }
 0x3ad   : > { %1738 = shalt.err (!%p1735_p4)
}
 0x3ae   : > { %s1739_s5 = scalar_lea.hbm %s3048_s28, 16384  ;;  %s1743_s14 = scalar_lea.hbm %s3101_s1, 32768 }
 0x3af   : > { %p1740_p5 = scmp.ne.s32.totalorder %s3048_s28, %s1739_s5  ;;  %p1744_p0 = scmp.lt.u32.totalorder %s3048_s28, %s3101_s1 }
 0x3b0   : > { %p1745_p1 = scmp.lt.u32.totalorder %s1743_s14, %s1739_s5  ;;  %p1747_p6 = scmp.lt.u32.totalorder %s1739_s5, %s3048_s28 }
 0x3b1   : > { %p1741_p8 = pnand %p1740_p5, %p3227_p11 }
 0x3b2   : > { %p1746_p3 = por %p1745_p1, %p1744_p0 }
 0x3b3   : > { %p1742_p9 = pneg %p1741_p8 }
 0x3b4   : > { %p1748_p12 = por %p1747_p6, %p1746_p3 }
 0x3b6   : > { %p1749_p13 = pnand %p1748_p12, %p1742_p9 }
 0x3b8   : > { %1752 = shalt.err (!%p1749_p13)
}
 0x3b9   : > { %1265 = dma.vmem_to_hbm [thread:$0]  (%p3227_p11), %s3050_s26, 16384, %s3048_s28, %s1163_s29  }
 0x3ba PF: > { %s1189_s21 = sand.u32 1, %s1779_s6   ;;  %p3228_p7 = scmp.ne.s32.totalorder %s3145_s19, 0 }
 0x3bb   : > { %p3229_p10 = scmp.ge.s32.totalorder %s1791_s9, 2  ;;  %s1190_s22 = scalar_lea.sflag [#allocation4], %s1189_s21 }
 0x3bd   : > { %p1272_p2 = pnand %p3229_p10, %p3228_p7 }
 0x3bf   : > { %1774 = dma.done.wait (!%p1272_p2), %s1190_s22, 16384  }
 0x3c0   : > { %1776 = vsyncadd (!%p1272_p2), %s1190_s22, 4294950912  ;;  %p14_p4 = scmp.ge.s32.totalorder %s1830_s12, 4   ;;  %s3230_s6 = smov %s1783_s7 }
 0x3c1   : > { %s3231_s7 = smov %s1787_s8  ;;  %s3232_s8 = smov %s1842_s15 }
 0x3c2   : > { %s3233_s9 = smov %s1830_s12  ;;  %16 = sbr.rel (!%p14_p4) target bundleno = 5 (0x5), region = 69 }
 0x3c9   :  { %1195 = vsyncpa [#allocation3], 1 }
 0x3ca   :  { %1197 = vsyncpa [#allocation3 + $0x1], 1 }
 0x3cb   :  { %1198 = vsyncpa [#allocation4], 1 }
 0x3cc   :  { %1200 = vsyncpa [#allocation4 + $0x1], 1 }

</bundles_post_ra>
